<compile_context>
chip_gen: v6e
topology: v6e:2x2x1
jax: 0.10.0
libtpu: 0.0.40
codegen_flags: <defaults>
</compile_context>

<pallas_src>
import numpy as np
import jax
import jax.numpy as jnp
from jax.experimental import pallas as pl
from jax.experimental.pallas import tpu as pltpu

GAT_NEG_SLOPE = 0.2    # torch_geometric GATConv attention LeakyReLU
ACT_NEG_SLOPE = 0.01   # nn.LeakyReLU() default (self.activation)
MASK_NEG = 1e9


def _vmem_spec():
    return pl.BlockSpec(memory_space=pltpu.MemorySpace.VMEM)


def _round_up(v, m):
    return ((v + m - 1) // m) * m


def _pad2(a, shape):
    out = jnp.zeros(shape, a.dtype)
    return out.at[: a.shape[0], : a.shape[1]].set(a)


# ---------------------------------------------------------------------------
# Fused forward kernel (built for a given number of GAT layers / VN MLPs)
# ---------------------------------------------------------------------------
def _build_kernel(n_gat, n_mlp):
    def kernel(*refs):
        idx = 0
        x_ref = refs[idx]; idx += 1
        adj_ref = refs[idx]; idx += 1
        mask_ref = refs[idx]; idx += 1
        gat_refs = []
        for _ in range(n_gat):
            gat_refs.append(refs[idx: idx + 4]); idx += 4
        wout_ref = refs[idx]; bout_ref = refs[idx + 1]; idx += 2
        mlp_refs = []
        for _ in range(n_mlp):
            mlp_refs.append(refs[idx: idx + 4]); idx += 4
        xout_ref = refs[idx]; vn_ref = refs[idx + 1]

        # Additive attention mask, computed once and reused by every GAT layer.
        neg_bias = (adj_ref[...] - 1.0) * MASK_NEG            # 0 on edges, -1e9 elsewhere

        h = x_ref[...]                                        # (Np, Fp) f32
        for (w_ref, asrc_ref, adst_ref, bias_ref) in gat_refs:
            # Linear transform (bf16 MXU operands, f32 accumulation).
            hw = jnp.dot(h.astype(jnp.bfloat16), w_ref[...],
                         preferred_element_type=jnp.float32)  # (Np, Hp)
            # Attention terms: e_dst as (Np,1) column, e_src as (1,Np) row — no (N,N) matmul.
            e_dst = jax.lax.dot_general(hw, adst_ref[...],
                                        (((1,), (1,)), ((), ())),
                                        preferred_element_type=jnp.float32)   # (Np, 1)
            e_src = jax.lax.dot_general(asrc_ref[...], hw,
                                        (((1,), (1,)), ((), ())),
                                        preferred_element_type=jnp.float32)   # (1, Np)
            s = e_dst + e_src                                                  # broadcast add
            s = jnp.where(s > 0, s, GAT_NEG_SLOPE * s)                         # LeakyReLU(0.2)
            s = s + neg_bias                                                   # mask non-edges
            m = jnp.max(s, axis=1, keepdims=True)
            p = jnp.exp(s - m)                                                 # masked -> exact 0
            inv = pl.reciprocal(jnp.sum(p, axis=1, keepdims=True), approx=True)
            alpha = p * inv                                                    # softmax over sources
            h = jnp.dot(alpha.astype(jnp.bfloat16), hw.astype(jnp.bfloat16),
                        preferred_element_type=jnp.float32) + bias_ref[...]
            h = jnp.where(h > 0, h, ACT_NEG_SLOPE * h)                         # self.activation

        # Node-wise output Linear.
        xout_ref[...] = jnp.dot(h.astype(jnp.bfloat16), wout_ref[...],
                                preferred_element_type=jnp.float32) + bout_ref[...]

        # Virtual node: global sum pool over real nodes, then the VN MLP stack.
        vn = jnp.sum(h * mask_ref[...], axis=0, keepdims=True)                 # (1, Hp)
        for (w1_ref, b1_ref, w2_ref, b2_ref) in mlp_refs:
            vn = jnp.maximum(jnp.dot(vn.astype(jnp.bfloat16), w1_ref[...],
                                     preferred_element_type=jnp.float32) + b1_ref[...], 0.0)
            vn = jnp.maximum(jnp.dot(vn.astype(jnp.bfloat16), w2_ref[...],
                                     preferred_element_type=jnp.float32) + b2_ref[...], 0.0)
        vn_ref[...] = vn

    return kernel


# ---------------------------------------------------------------------------
# Wrapper: pad to lane/sublane-friendly shapes, launch one fused pallas_call.
# ---------------------------------------------------------------------------
def cnn_final_vn_forward(x, adj, params):
    n, f_in = x.shape
    hidden = params["gats"][0]["w"].shape[1]
    out_dim = params["w_out"].shape[1]
    n_gat = len(params["gats"])
    n_mlp = len(params["mlps"])

    np_pad = _round_up(n, 8)         # sublane multiple
    fp = _round_up(f_in, 128)        # lane-dense feature dims
    hp = _round_up(hidden, 128)
    op = _round_up(out_dim, 128)

    xp = _pad2(x.astype(jnp.float32), (np_pad, fp))
    adjp = _pad2(adj.astype(jnp.float32), (np_pad, np_pad))
    maskp = _pad2(jnp.ones((n, 1), jnp.float32), (np_pad, 1))

    inputs = [xp, adjp, maskp]
    for i, g in enumerate(params["gats"]):
        fi = fp if i == 0 else hp
        inputs += [
            _pad2(g["w"], (fi, hp)).astype(jnp.bfloat16),   # MXU operand -> bf16
            _pad2(g["att_src"], (1, hp)),
            _pad2(g["att_dst"], (1, hp)),
            _pad2(g["bias"], (1, hp)),
        ]
    inputs += [
        _pad2(params["w_out"], (hp, op)).astype(jnp.bfloat16),
        _pad2(params["b_out"], (1, op)),
    ]
    for i, m in enumerate(params["mlps"]):
        d2 = op if i == n_mlp - 1 else hp                   # last VN MLP maps hidden -> output
        inputs += [
            _pad2(m["w1"], (hp, hp)).astype(jnp.bfloat16),
            _pad2(m["b1"], (1, hp)),
            _pad2(m["w2"], (hp, d2)).astype(jnp.bfloat16),
            _pad2(m["b2"], (1, d2)),
        ]

    # Explicit scoped-VMEM limit sized to the (tiny) resident working set.
    in_bytes = sum(int(a.size) * a.dtype.itemsize for a in inputs)
    work_bytes = in_bytes + 4 * np_pad * np_pad * 4 + 4 * np_pad * max(hp, op) * 4
    vmem_limit = int(min(max(4 * 1024 * 1024, 4 * work_bytes), 32 * 1024 * 1024))

    kernel = _build_kernel(n_gat, n_mlp)
    x_out_p, vn_p = pl.pallas_call(
        kernel,
        out_shape=(jax.ShapeDtypeStruct((np_pad, op), jnp.float32),
                   jax.ShapeDtypeStruct((1, op), jnp.float32)),
        in_specs=[_vmem_spec()] * len(inputs),
        out_specs=(_vmem_spec(), _vmem_spec()),
        compiler_params=pltpu.CompilerParams(vmem_limit_bytes=vmem_limit),
    )(*inputs)

    return x_out_p[:n, :out_dim], vn_p[0, :out_dim]


# ---------------------------------------------------------------------------
# Pure-JAX f32 reference (module semantics) for correctness checking.
# ---------------------------------------------------------------------------
def _gat_ref(x, adj, p):
    h = x @ p["w"]
    e_src = jnp.sum(h * p["att_src"], axis=1)
    e_dst = jnp.sum(h * p["att_dst"], axis=1)
    s = e_dst[:, None] + e_src[None, :]
    s = jnp.where(s > 0, s, GAT_NEG_SLOPE * s)
    s = jnp.where(adj > 0, s, -MASK_NEG)
    pm = jnp.exp(s - s.max(axis=1, keepdims=True)) * (adj > 0)
    alpha = pm / pm.sum(axis=1, keepdims=True)
    return alpha @ h + p["bias"]


def reference_forward(x, adj, params):
    h = x
    for g in params["gats"]:
        h = _gat_ref(h, adj, g)
        h = jnp.where(h > 0, h, ACT_NEG_SLOPE * h)
    out = h
    x_out = out @ params["w_out"] + params["b_out"]
    vn = jnp.sum(out, axis=0, keepdims=True)
    for m in params["mlps"]:
        vn = jnp.maximum(vn @ m["w1"] + m["b1"], 0.0)
        vn = jnp.maximum(vn @ m["w2"] + m["b2"], 0.0)
    return x_out, vn[0]


# ---------------------------------------------------------------------------
# Deterministic parameter init (shapes per CNN_Final_VN_Model.__init__)
# ---------------------------------------------------------------------------
def init_params(key, f_in, hidden, out_dim, layers):
    def glorot(k, shape):
        lim = float(np.sqrt(6.0 / (shape[0] + shape[-1])))
        return jax.random.uniform(k, shape, jnp.float32, -lim, lim)

    def linear(k, fi, fo):
        k1, k2 = jax.random.split(k)
        lim = float(1.0 / np.sqrt(fi))
        return (jax.random.uniform(k1, (fi, fo), jnp.float32, -lim, lim),
                jax.random.uniform(k2, (1, fo), jnp.float32, -lim, lim))

    def gat_p(k, fi, fo):
        k1, k2, k3 = jax.random.split(k, 3)
        return {"w": glorot(k1, (fi, fo)),
                "att_src": glorot(k2, (1, fo)),
                "att_dst": glorot(k3, (1, fo)),
                "bias": jnp.zeros((1, fo), jnp.float32)}

    n_keys = layers + 1 + 2 * (layers - 1)
    keys = jax.random.split(key, n_keys)
    ki = iter(range(n_keys))

    gats = [gat_p(keys[next(ki)], f_in, hidden)]
    gats += [gat_p(keys[next(ki)], hidden, hidden) for _ in range(layers - 1)]
    w_out, b_out = linear(keys[next(ki)], hidden, out_dim)

    mlps = []
    for _ in range(layers - 2):                        # hidden -> hidden VN MLPs
        w1, b1 = linear(keys[next(ki)], hidden, hidden)
        w2, b2 = linear(keys[next(ki)], hidden, hidden)
        mlps.append({"w1": w1, "b1": b1, "w2": w2, "b2": b2})
    w1, b1 = linear(keys[next(ki)], hidden, hidden)    # final VN MLP: hidden -> output
    w2, b2 = linear(keys[next(ki)], hidden, out_dim)
    mlps.append({"w1": w1, "b1": b1, "w2": w2, "b2": b2})

    return {"gats": gats, "w_out": w_out, "b_out": b_out, "mlps": mlps}


if __name__ == "__main__":
    S, F_IN, HIDDEN, OUT, LAYERS = 4, 3, 32, 20, 3
    N = S * S

    key = jax.random.PRNGKey(0)
    k_x, k_p = jax.random.split(key)
    x = jax.random.normal(k_x, (N, F_IN), jnp.float32)

    # 4-neighbour grid graph ("CNN final feature map" as a graph); dense mask
    # adj[target, source] with self-loops (GATConv add_self_loops=True).
    adj_np = np.eye(N, dtype=np.float32)
    for r in range(S):
        for c in range(S):
            i = r * S + c
            for dr, dc in ((1, 0), (-1, 0), (0, 1), (0, -1)):
                rr, cc = r + dr, c + dc
                if 0 <= rr < S and 0 <= cc < S:
                    adj_np[i, rr * S + cc] = 1.0
    adj = jnp.asarray(adj_np)

    params = init_params(k_p, F_IN, HIDDEN, OUT, LAYERS)

    x_out, vn = cnn_final_vn_forward(x, adj, params)
    x_out, vn = jax.block_until_ready((x_out, vn))

    x_ref, vn_ref = reference_forward(x, adj, params)
    # Tolerance covers bf16 MXU operands + approx reciprocal in the kernel vs f32 reference.
    np.testing.assert_allclose(np.asarray(x_out), np.asarray(x_ref), rtol=5e-2, atol=5e-2)
    np.testing.assert_allclose(np.asarray(vn), np.asarray(vn_ref), rtol=5e-2, atol=5e-2)

    print("KERNEL_OK")
</pallas_src>

<mosaic_0001>
module attributes {stable_mosaic.version = 11 : i64} {
  func.func @kernel(%arg0: memref<16x128xf32, #tpu.memory_space<vmem>>, %arg1: memref<16x16xf32, #tpu.memory_space<vmem>>, %arg2: memref<16x1xf32, #tpu.memory_space<vmem>>, %arg3: memref<128x128xbf16, #tpu.memory_space<vmem>>, %arg4: memref<1x128xf32, #tpu.memory_space<vmem>>, %arg5: memref<1x128xf32, #tpu.memory_space<vmem>>, %arg6: memref<1x128xf32, #tpu.memory_space<vmem>>, %arg7: memref<128x128xbf16, #tpu.memory_space<vmem>>, %arg8: memref<1x128xf32, #tpu.memory_space<vmem>>, %arg9: memref<1x128xf32, #tpu.memory_space<vmem>>, %arg10: memref<1x128xf32, #tpu.memory_space<vmem>>, %arg11: memref<128x128xbf16, #tpu.memory_space<vmem>>, %arg12: memref<1x128xf32, #tpu.memory_space<vmem>>, %arg13: memref<1x128xf32, #tpu.memory_space<vmem>>, %arg14: memref<1x128xf32, #tpu.memory_space<vmem>>, %arg15: memref<128x128xbf16, #tpu.memory_space<vmem>>, %arg16: memref<1x128xf32, #tpu.memory_space<vmem>>, %arg17: memref<128x128xbf16, #tpu.memory_space<vmem>>, %arg18: memref<1x128xf32, #tpu.memory_space<vmem>>, %arg19: memref<128x128xbf16, #tpu.memory_space<vmem>>, %arg20: memref<1x128xf32, #tpu.memory_space<vmem>>, %arg21: memref<128x128xbf16, #tpu.memory_space<vmem>>, %arg22: memref<1x128xf32, #tpu.memory_space<vmem>>, %arg23: memref<128x128xbf16, #tpu.memory_space<vmem>>, %arg24: memref<1x128xf32, #tpu.memory_space<vmem>>, %arg25: memref<16x128xf32, #tpu.memory_space<vmem>>, %arg26: memref<1x128xf32, #tpu.memory_space<vmem>>) attributes {dimension_semantics = [], scalar_prefetch = 0 : i64, scratch_operands = 0 : i64, tpu.core_type = #tpu.core_type<tc>} {
    %c0 = arith.constant 0 : index
    %c0_0 = arith.constant 0 : index
    %0 = vector.load %arg1[%c0, %c0_0] : memref<16x16xf32, #tpu.memory_space<vmem>>, vector<16x16xf32>
    %cst = arith.constant 1.000000e+00 : f32
    %1 = vector.broadcast %cst : f32 to vector<16x16xf32>
    %2 = arith.subf %0, %1 : vector<16x16xf32>
    %cst_1 = arith.constant 1.000000e+09 : f32
    %3 = vector.broadcast %cst_1 : f32 to vector<16x16xf32>
    %4 = arith.mulf %2, %3 : vector<16x16xf32>
    %c0_2 = arith.constant 0 : index
    %c0_3 = arith.constant 0 : index
    %5 = vector.load %arg0[%c0_2, %c0_3] : memref<16x128xf32, #tpu.memory_space<vmem>>, vector<16x128xf32>
    %6 = arith.truncf %5 : vector<16x128xf32> to vector<16x128xbf16>
    %c0_4 = arith.constant 0 : index
    %c0_5 = arith.constant 0 : index
    %7 = vector.load %arg3[%c0_4, %c0_5] : memref<128x128xbf16, #tpu.memory_space<vmem>>, vector<128x128xbf16>
    %cst_6 = arith.constant dense<0.000000e+00> : vector<16x128xf32>
    %8 = tpu.matmul %6, %7, %cst_6 {dimension_numbers = #tpu.dot_dimension_numbers<[1], [0], [0], [1], [0, 0, 1, 1], [], []>} : vector<16x128xbf16>, vector<128x128xbf16>, vector<16x128xf32> -> vector<16x128xf32>
    %c0_7 = arith.constant 0 : index
    %c0_8 = arith.constant 0 : index
    %9 = vector.load %arg5[%c0_7, %c0_8] : memref<1x128xf32, #tpu.memory_space<vmem>>, vector<1x128xf32>
    %cst_9 = arith.constant dense<0.000000e+00> : vector<16x1xf32>
    %10 = tpu.matmul %8, %9, %cst_9 {dimension_numbers = #tpu.dot_dimension_numbers<[1], [1], [0], [0], [0, 0, 1, 0], [], []>} : vector<16x128xf32>, vector<1x128xf32>, vector<16x1xf32> -> vector<16x1xf32>
    %c0_10 = arith.constant 0 : index
    %c0_11 = arith.constant 0 : index
    %11 = vector.load %arg4[%c0_10, %c0_11] : memref<1x128xf32, #tpu.memory_space<vmem>>, vector<1x128xf32>
    %cst_12 = arith.constant dense<0.000000e+00> : vector<1x16xf32>
    %12 = tpu.matmul %11, %8, %cst_12 {dimension_numbers = #tpu.dot_dimension_numbers<[1], [1], [0], [0], [0, 0, 1, 0], [], []>} : vector<1x128xf32>, vector<16x128xf32>, vector<1x16xf32> -> vector<1x16xf32>
    %13 = vector.broadcast %10 : vector<16x1xf32> to vector<16x16xf32>
    %14 = vector.broadcast %12 : vector<1x16xf32> to vector<16x16xf32>
    %15 = arith.addf %13, %14 : vector<16x16xf32>
    %cst_13 = arith.constant 0.000000e+00 : f32
    %16 = vector.broadcast %cst_13 : f32 to vector<16x16xf32>
    %17 = arith.cmpf ogt, %15, %16 : vector<16x16xf32>
    %cst_14 = arith.constant 2.000000e-01 : f32
    %18 = vector.broadcast %cst_14 : f32 to vector<16x16xf32>
    %19 = arith.mulf %18, %15 : vector<16x16xf32>
    %20 = arith.select %17, %15, %19 : vector<16x16xi1>, vector<16x16xf32>
    %21 = arith.addf %20, %4 : vector<16x16xf32>
    %cst_15 = arith.constant dense<0xFF800000> : vector<16xf32>
    %22 = vector.multi_reduction <maximumf>, %21, %cst_15 [1] : vector<16x16xf32> to vector<16xf32>
    %23 = vector.shape_cast %22 : vector<16xf32> to vector<16x1xf32>
    %24 = vector.broadcast %23 : vector<16x1xf32> to vector<16x16xf32>
    %25 = arith.subf %21, %24 : vector<16x16xf32>
    %26 = math.exp %25 : vector<16x16xf32>
    %cst_16 = arith.constant dense<0.000000e+00> : vector<16xf32>
    %27 = vector.multi_reduction <add>, %26, %cst_16 [1] : vector<16x16xf32> to vector<16xf32>
    %28 = vector.shape_cast %27 : vector<16xf32> to vector<16x1xf32>
    %29 = tpu.reciprocal %28 {approx = true} : vector<16x1xf32> -> vector<16x1xf32>
    %30 = vector.broadcast %29 : vector<16x1xf32> to vector<16x16xf32>
    %31 = arith.mulf %26, %30 : vector<16x16xf32>
    %32 = arith.truncf %31 : vector<16x16xf32> to vector<16x16xbf16>
    %33 = arith.truncf %8 : vector<16x128xf32> to vector<16x128xbf16>
    %cst_17 = arith.constant dense<0.000000e+00> : vector<16x128xf32>
    %34 = tpu.matmul %32, %33, %cst_17 {dimension_numbers = #tpu.dot_dimension_numbers<[1], [0], [0], [1], [0, 0, 1, 1], [], []>} : vector<16x16xbf16>, vector<16x128xbf16>, vector<16x128xf32> -> vector<16x128xf32>
    %c0_18 = arith.constant 0 : index
    %c0_19 = arith.constant 0 : index
    %35 = vector.load %arg6[%c0_18, %c0_19] : memref<1x128xf32, #tpu.memory_space<vmem>>, vector<1x128xf32>
    %36 = vector.broadcast %35 : vector<1x128xf32> to vector<16x128xf32>
    %37 = arith.addf %34, %36 : vector<16x128xf32>
    %cst_20 = arith.constant 0.000000e+00 : f32
    %38 = vector.broadcast %cst_20 : f32 to vector<16x128xf32>
    %39 = arith.cmpf ogt, %37, %38 : vector<16x128xf32>
    %cst_21 = arith.constant 0.00999999977 : f32
    %40 = vector.broadcast %cst_21 : f32 to vector<16x128xf32>
    %41 = arith.mulf %40, %37 : vector<16x128xf32>
    %42 = arith.select %39, %37, %41 : vector<16x128xi1>, vector<16x128xf32>
    %43 = arith.truncf %42 : vector<16x128xf32> to vector<16x128xbf16>
    %c0_22 = arith.constant 0 : index
    %c0_23 = arith.constant 0 : index
    %44 = vector.load %arg7[%c0_22, %c0_23] : memref<128x128xbf16, #tpu.memory_space<vmem>>, vector<128x128xbf16>
    %cst_24 = arith.constant dense<0.000000e+00> : vector<16x128xf32>
    %45 = tpu.matmul %43, %44, %cst_24 {dimension_numbers = #tpu.dot_dimension_numbers<[1], [0], [0], [1], [0, 0, 1, 1], [], []>} : vector<16x128xbf16>, vector<128x128xbf16>, vector<16x128xf32> -> vector<16x128xf32>
    %c0_25 = arith.constant 0 : index
    %c0_26 = arith.constant 0 : index
    %46 = vector.load %arg9[%c0_25, %c0_26] : memref<1x128xf32, #tpu.memory_space<vmem>>, vector<1x128xf32>
    %cst_27 = arith.constant dense<0.000000e+00> : vector<16x1xf32>
    %47 = tpu.matmul %45, %46, %cst_27 {dimension_numbers = #tpu.dot_dimension_numbers<[1], [1], [0], [0], [0, 0, 1, 0], [], []>} : vector<16x128xf32>, vector<1x128xf32>, vector<16x1xf32> -> vector<16x1xf32>
    %c0_28 = arith.constant 0 : index
    %c0_29 = arith.constant 0 : index
    %48 = vector.load %arg8[%c0_28, %c0_29] : memref<1x128xf32, #tpu.memory_space<vmem>>, vector<1x128xf32>
    %cst_30 = arith.constant dense<0.000000e+00> : vector<1x16xf32>
    %49 = tpu.matmul %48, %45, %cst_30 {dimension_numbers = #tpu.dot_dimension_numbers<[1], [1], [0], [0], [0, 0, 1, 0], [], []>} : vector<1x128xf32>, vector<16x128xf32>, vector<1x16xf32> -> vector<1x16xf32>
    %50 = vector.broadcast %47 : vector<16x1xf32> to vector<16x16xf32>
    %51 = vector.broadcast %49 : vector<1x16xf32> to vector<16x16xf32>
    %52 = arith.addf %50, %51 : vector<16x16xf32>
    %cst_31 = arith.constant 0.000000e+00 : f32
    %53 = vector.broadcast %cst_31 : f32 to vector<16x16xf32>
    %54 = arith.cmpf ogt, %52, %53 : vector<16x16xf32>
    %cst_32 = arith.constant 2.000000e-01 : f32
    %55 = vector.broadcast %cst_32 : f32 to vector<16x16xf32>
    %56 = arith.mulf %55, %52 : vector<16x16xf32>
    %57 = arith.select %54, %52, %56 : vector<16x16xi1>, vector<16x16xf32>
    %58 = arith.addf %57, %4 : vector<16x16xf32>
    %cst_33 = arith.constant dense<0xFF800000> : vector<16xf32>
    %59 = vector.multi_reduction <maximumf>, %58, %cst_33 [1] : vector<16x16xf32> to vector<16xf32>
    %60 = vector.shape_cast %59 : vector<16xf32> to vector<16x1xf32>
    %61 = vector.broadcast %60 : vector<16x1xf32> to vector<16x16xf32>
    %62 = arith.subf %58, %61 : vector<16x16xf32>
    %63 = math.exp %62 : vector<16x16xf32>
    %cst_34 = arith.constant dense<0.000000e+00> : vector<16xf32>
    %64 = vector.multi_reduction <add>, %63, %cst_34 [1] : vector<16x16xf32> to vector<16xf32>
    %65 = vector.shape_cast %64 : vector<16xf32> to vector<16x1xf32>
    %66 = tpu.reciprocal %65 {approx = true} : vector<16x1xf32> -> vector<16x1xf32>
    %67 = vector.broadcast %66 : vector<16x1xf32> to vector<16x16xf32>
    %68 = arith.mulf %63, %67 : vector<16x16xf32>
    %69 = arith.truncf %68 : vector<16x16xf32> to vector<16x16xbf16>
    %70 = arith.truncf %45 : vector<16x128xf32> to vector<16x128xbf16>
    %cst_35 = arith.constant dense<0.000000e+00> : vector<16x128xf32>
    %71 = tpu.matmul %69, %70, %cst_35 {dimension_numbers = #tpu.dot_dimension_numbers<[1], [0], [0], [1], [0, 0, 1, 1], [], []>} : vector<16x16xbf16>, vector<16x128xbf16>, vector<16x128xf32> -> vector<16x128xf32>
    %c0_36 = arith.constant 0 : index
    %c0_37 = arith.constant 0 : index
    %72 = vector.load %arg10[%c0_36, %c0_37] : memref<1x128xf32, #tpu.memory_space<vmem>>, vector<1x128xf32>
    %73 = vector.broadcast %72 : vector<1x128xf32> to vector<16x128xf32>
    %74 = arith.addf %71, %73 : vector<16x128xf32>
    %cst_38 = arith.constant 0.000000e+00 : f32
    %75 = vector.broadcast %cst_38 : f32 to vector<16x128xf32>
    %76 = arith.cmpf ogt, %74, %75 : vector<16x128xf32>
    %cst_39 = arith.constant 0.00999999977 : f32
    %77 = vector.broadcast %cst_39 : f32 to vector<16x128xf32>
    %78 = arith.mulf %77, %74 : vector<16x128xf32>
    %79 = arith.select %76, %74, %78 : vector<16x128xi1>, vector<16x128xf32>
    %80 = arith.truncf %79 : vector<16x128xf32> to vector<16x128xbf16>
    %c0_40 = arith.constant 0 : index
    %c0_41 = arith.constant 0 : index
    %81 = vector.load %arg11[%c0_40, %c0_41] : memref<128x128xbf16, #tpu.memory_space<vmem>>, vector<128x128xbf16>
    %cst_42 = arith.constant dense<0.000000e+00> : vector<16x128xf32>
    %82 = tpu.matmul %80, %81, %cst_42 {dimension_numbers = #tpu.dot_dimension_numbers<[1], [0], [0], [1], [0, 0, 1, 1], [], []>} : vector<16x128xbf16>, vector<128x128xbf16>, vector<16x128xf32> -> vector<16x128xf32>
    %c0_43 = arith.constant 0 : index
    %c0_44 = arith.constant 0 : index
    %83 = vector.load %arg13[%c0_43, %c0_44] : memref<1x128xf32, #tpu.memory_space<vmem>>, vector<1x128xf32>
    %cst_45 = arith.constant dense<0.000000e+00> : vector<16x1xf32>
    %84 = tpu.matmul %82, %83, %cst_45 {dimension_numbers = #tpu.dot_dimension_numbers<[1], [1], [0], [0], [0, 0, 1, 0], [], []>} : vector<16x128xf32>, vector<1x128xf32>, vector<16x1xf32> -> vector<16x1xf32>
    %c0_46 = arith.constant 0 : index
    %c0_47 = arith.constant 0 : index
    %85 = vector.load %arg12[%c0_46, %c0_47] : memref<1x128xf32, #tpu.memory_space<vmem>>, vector<1x128xf32>
    %cst_48 = arith.constant dense<0.000000e+00> : vector<1x16xf32>
    %86 = tpu.matmul %85, %82, %cst_48 {dimension_numbers = #tpu.dot_dimension_numbers<[1], [1], [0], [0], [0, 0, 1, 0], [], []>} : vector<1x128xf32>, vector<16x128xf32>, vector<1x16xf32> -> vector<1x16xf32>
    %87 = vector.broadcast %84 : vector<16x1xf32> to vector<16x16xf32>
    %88 = vector.broadcast %86 : vector<1x16xf32> to vector<16x16xf32>
    %89 = arith.addf %87, %88 : vector<16x16xf32>
    %cst_49 = arith.constant 0.000000e+00 : f32
    %90 = vector.broadcast %cst_49 : f32 to vector<16x16xf32>
    %91 = arith.cmpf ogt, %89, %90 : vector<16x16xf32>
    %cst_50 = arith.constant 2.000000e-01 : f32
    %92 = vector.broadcast %cst_50 : f32 to vector<16x16xf32>
    %93 = arith.mulf %92, %89 : vector<16x16xf32>
    %94 = arith.select %91, %89, %93 : vector<16x16xi1>, vector<16x16xf32>
    %95 = arith.addf %94, %4 : vector<16x16xf32>
    %cst_51 = arith.constant dense<0xFF800000> : vector<16xf32>
    %96 = vector.multi_reduction <maximumf>, %95, %cst_51 [1] : vector<16x16xf32> to vector<16xf32>
    %97 = vector.shape_cast %96 : vector<16xf32> to vector<16x1xf32>
    %98 = vector.broadcast %97 : vector<16x1xf32> to vector<16x16xf32>
    %99 = arith.subf %95, %98 : vector<16x16xf32>
    %100 = math.exp %99 : vector<16x16xf32>
    %cst_52 = arith.constant dense<0.000000e+00> : vector<16xf32>
    %101 = vector.multi_reduction <add>, %100, %cst_52 [1] : vector<16x16xf32> to vector<16xf32>
    %102 = vector.shape_cast %101 : vector<16xf32> to vector<16x1xf32>
    %103 = tpu.reciprocal %102 {approx = true} : vector<16x1xf32> -> vector<16x1xf32>
    %104 = vector.broadcast %103 : vector<16x1xf32> to vector<16x16xf32>
    %105 = arith.mulf %100, %104 : vector<16x16xf32>
    %106 = arith.truncf %105 : vector<16x16xf32> to vector<16x16xbf16>
    %107 = arith.truncf %82 : vector<16x128xf32> to vector<16x128xbf16>
    %cst_53 = arith.constant dense<0.000000e+00> : vector<16x128xf32>
    %108 = tpu.matmul %106, %107, %cst_53 {dimension_numbers = #tpu.dot_dimension_numbers<[1], [0], [0], [1], [0, 0, 1, 1], [], []>} : vector<16x16xbf16>, vector<16x128xbf16>, vector<16x128xf32> -> vector<16x128xf32>
    %c0_54 = arith.constant 0 : index
    %c0_55 = arith.constant 0 : index
    %109 = vector.load %arg14[%c0_54, %c0_55] : memref<1x128xf32, #tpu.memory_space<vmem>>, vector<1x128xf32>
    %110 = vector.broadcast %109 : vector<1x128xf32> to vector<16x128xf32>
    %111 = arith.addf %108, %110 : vector<16x128xf32>
    %cst_56 = arith.constant 0.000000e+00 : f32
    %112 = vector.broadcast %cst_56 : f32 to vector<16x128xf32>
    %113 = arith.cmpf ogt, %111, %112 : vector<16x128xf32>
    %cst_57 = arith.constant 0.00999999977 : f32
    %114 = vector.broadcast %cst_57 : f32 to vector<16x128xf32>
    %115 = arith.mulf %114, %111 : vector<16x128xf32>
    %116 = arith.select %113, %111, %115 : vector<16x128xi1>, vector<16x128xf32>
    %117 = arith.truncf %116 : vector<16x128xf32> to vector<16x128xbf16>
    %c0_58 = arith.constant 0 : index
    %c0_59 = arith.constant 0 : index
    %118 = vector.load %arg15[%c0_58, %c0_59] : memref<128x128xbf16, #tpu.memory_space<vmem>>, vector<128x128xbf16>
    %cst_60 = arith.constant dense<0.000000e+00> : vector<16x128xf32>
    %119 = tpu.matmul %117, %118, %cst_60 {dimension_numbers = #tpu.dot_dimension_numbers<[1], [0], [0], [1], [0, 0, 1, 1], [], []>} : vector<16x128xbf16>, vector<128x128xbf16>, vector<16x128xf32> -> vector<16x128xf32>
    %c0_61 = arith.constant 0 : index
    %c0_62 = arith.constant 0 : index
    %120 = vector.load %arg16[%c0_61, %c0_62] : memref<1x128xf32, #tpu.memory_space<vmem>>, vector<1x128xf32>
    %121 = vector.broadcast %120 : vector<1x128xf32> to vector<16x128xf32>
    %122 = arith.addf %119, %121 : vector<16x128xf32>
    %c0_63 = arith.constant 0 : index
    %c0_64 = arith.constant 0 : index
    %123 = vector.load %arg25[%c0_63, %c0_64] : memref<16x128xf32, #tpu.memory_space<vmem>>, vector<16x128xf32>
    tpu.vector_store %arg25[%c0_63, %c0_64], %122 {strides = array<i32>} : memref<16x128xf32, #tpu.memory_space<vmem>>, vector<16x128xf32>,
    %c0_65 = arith.constant 0 : index
    %c0_66 = arith.constant 0 : index
    %124 = vector.load %arg2[%c0_65, %c0_66] : memref<16x1xf32, #tpu.memory_space<vmem>>, vector<16x1xf32>
    %125 = vector.broadcast %124 : vector<16x1xf32> to vector<16x128xf32>
    %126 = arith.mulf %116, %125 : vector<16x128xf32>
    %cst_67 = arith.constant dense<0.000000e+00> : vector<128xf32>
    %127 = vector.multi_reduction <add>, %126, %cst_67 [0] : vector<16x128xf32> to vector<128xf32>
    %128 = vector.shape_cast %127 : vector<128xf32> to vector<1x128xf32>
    %129 = arith.truncf %128 : vector<1x128xf32> to vector<1x128xbf16>
    %c0_68 = arith.constant 0 : index
    %c0_69 = arith.constant 0 : index
    %130 = vector.load %arg17[%c0_68, %c0_69] : memref<128x128xbf16, #tpu.memory_space<vmem>>, vector<128x128xbf16>
    %cst_70 = arith.constant dense<0.000000e+00> : vector<1x128xf32>
    %131 = tpu.matmul %129, %130, %cst_70 {dimension_numbers = #tpu.dot_dimension_numbers<[1], [0], [0], [1], [0, 0, 1, 1], [], []>} : vector<1x128xbf16>, vector<128x128xbf16>, vector<1x128xf32> -> vector<1x128xf32>
    %c0_71 = arith.constant 0 : index
    %c0_72 = arith.constant 0 : index
    %132 = vector.load %arg18[%c0_71, %c0_72] : memref<1x128xf32, #tpu.memory_space<vmem>>, vector<1x128xf32>
    %133 = arith.addf %131, %132 : vector<1x128xf32>
    %cst_73 = arith.constant 0.000000e+00 : f32
    %134 = vector.broadcast %cst_73 : f32 to vector<1x128xf32>
    %135 = arith.maximumf %133, %134 : vector<1x128xf32>
    %136 = arith.truncf %135 : vector<1x128xf32> to vector<1x128xbf16>
    %c0_74 = arith.constant 0 : index
    %c0_75 = arith.constant 0 : index
    %137 = vector.load %arg19[%c0_74, %c0_75] : memref<128x128xbf16, #tpu.memory_space<vmem>>, vector<128x128xbf16>
    %cst_76 = arith.constant dense<0.000000e+00> : vector<1x128xf32>
    %138 = tpu.matmul %136, %137, %cst_76 {dimension_numbers = #tpu.dot_dimension_numbers<[1], [0], [0], [1], [0, 0, 1, 1], [], []>} : vector<1x128xbf16>, vector<128x128xbf16>, vector<1x128xf32> -> vector<1x128xf32>
    %c0_77 = arith.constant 0 : index
    %c0_78 = arith.constant 0 : index
    %139 = vector.load %arg20[%c0_77, %c0_78] : memref<1x128xf32, #tpu.memory_space<vmem>>, vector<1x128xf32>
    %140 = arith.addf %138, %139 : vector<1x128xf32>
    %cst_79 = arith.constant 0.000000e+00 : f32
    %141 = vector.broadcast %cst_79 : f32 to vector<1x128xf32>
    %142 = arith.maximumf %140, %141 : vector<1x128xf32>
    %143 = arith.truncf %142 : vector<1x128xf32> to vector<1x128xbf16>
    %c0_80 = arith.constant 0 : index
    %c0_81 = arith.constant 0 : index
    %144 = vector.load %arg21[%c0_80, %c0_81] : memref<128x128xbf16, #tpu.memory_space<vmem>>, vector<128x128xbf16>
    %cst_82 = arith.constant dense<0.000000e+00> : vector<1x128xf32>
    %145 = tpu.matmul %143, %144, %cst_82 {dimension_numbers = #tpu.dot_dimension_numbers<[1], [0], [0], [1], [0, 0, 1, 1], [], []>} : vector<1x128xbf16>, vector<128x128xbf16>, vector<1x128xf32> -> vector<1x128xf32>
    %c0_83 = arith.constant 0 : index
    %c0_84 = arith.constant 0 : index
    %146 = vector.load %arg22[%c0_83, %c0_84] : memref<1x128xf32, #tpu.memory_space<vmem>>, vector<1x128xf32>
    %147 = arith.addf %145, %146 : vector<1x128xf32>
    %cst_85 = arith.constant 0.000000e+00 : f32
    %148 = vector.broadcast %cst_85 : f32 to vector<1x128xf32>
    %149 = arith.maximumf %147, %148 : vector<1x128xf32>
    %150 = arith.truncf %149 : vector<1x128xf32> to vector<1x128xbf16>
    %c0_86 = arith.constant 0 : index
    %c0_87 = arith.constant 0 : index
    %151 = vector.load %arg23[%c0_86, %c0_87] : memref<128x128xbf16, #tpu.memory_space<vmem>>, vector<128x128xbf16>
    %cst_88 = arith.constant dense<0.000000e+00> : vector<1x128xf32>
    %152 = tpu.matmul %150, %151, %cst_88 {dimension_numbers = #tpu.dot_dimension_numbers<[1], [0], [0], [1], [0, 0, 1, 1], [], []>} : vector<1x128xbf16>, vector<128x128xbf16>, vector<1x128xf32> -> vector<1x128xf32>
    %c0_89 = arith.constant 0 : index
    %c0_90 = arith.constant 0 : index
    %153 = vector.load %arg24[%c0_89, %c0_90] : memref<1x128xf32, #tpu.memory_space<vmem>>, vector<1x128xf32>
    %154 = arith.addf %152, %153 : vector<1x128xf32>
    %cst_91 = arith.constant 0.000000e+00 : f32
    %155 = vector.broadcast %cst_91 : f32 to vector<1x128xf32>
    %156 = arith.maximumf %154, %155 : vector<1x128xf32>
    %c0_92 = arith.constant 0 : index
    %c0_93 = arith.constant 0 : index
    %157 = vector.load %arg26[%c0_92, %c0_93] : memref<1x128xf32, #tpu.memory_space<vmem>>, vector<1x128xf32>
    tpu.vector_store %arg26[%c0_92, %c0_93], %156 {strides = array<i32>} : memref<1x128xf32, #tpu.memory_space<vmem>>, vector<1x128xf32>,
    return
  }
}

</mosaic_0001>

<bundles_post_ra>
// kernel: tpu_custom_call.1
= control target key start
LH: loop header
LB: loop body
LE: loop exit
PB: predicated region body
PF: predicated region fallthrough
CT: control target
= control target key end

     0   :  { %s2776_s0 = inlined_call_operand.vmem [shape: f32[16,128], index: 0, kind: input, shape index: {}]   ;;  %s2777_s1 = inlined_call_operand.hbm [shape: f32[16,16], index: 1, kind: input, shape index: {}]   ;;  %s2778_s2 = inlined_call_operand.vmem [shape: f32[16,1], index: 2, kind: input, shape index: {}]   ;;  %s2779_s3 = inlined_call_operand.hbm [shape: bf16[128,128], index: 3, kind: input, shape index: {}]   ;;  %s2780_s4 = inlined_call_operand.vmem [shape: f32[1,128], index: 4, kind: input, shape index: {}]   ;;  %s2781_s5 = inlined_call_operand.vmem [shape: f32[1,128], index: 5, kind: input, shape index: {}]   ;;  %s2782_s6 = inlined_call_operand.vmem [shape: f32[1,128], index: 6, kind: input, shape index: {}]   ;;  %s2783_s7 = inlined_call_operand.hbm [shape: bf16[128,128], index: 7, kind: input, shape index: {}]   ;;  %s2784_s8 = inlined_call_operand.vmem [shape: f32[1,128], index: 8, kind: input, shape index: {}]   ;;  %s2785_s9 = inlined_call_operand.vmem [shape: f32[1,128], index: 9, kind: input, shape index: {}]   ;;  %s2786_s10 = inlined_call_operand.vmem [shape: f32[1,128], index: 10, kind: input, shape index: {}]   ;;  %s2787_s11 = inlined_call_operand.hbm [shape: bf16[128,128], index: 11, kind: input, shape index: {}]   ;;  %s2788_s12 = inlined_call_operand.vmem [shape: f32[1,128], index: 12, kind: input, shape index: {}]   ;;  %s2789_s13 = inlined_call_operand.vmem [shape: f32[1,128], index: 13, kind: input, shape index: {}]   ;;  %s2790_s14 = inlined_call_operand.vmem [shape: f32[1,128], index: 14, kind: input, shape index: {}]   ;;  %s2791_s15 = inlined_call_operand.hbm [shape: bf16[128,128], index: 15, kind: input, shape index: {}]   ;;  %s2792_s16 = inlined_call_operand.vmem [shape: f32[1,128], index: 16, kind: input, shape index: {}]   ;;  %s2793_s17 = inlined_call_operand.hbm [shape: bf16[128,128], index: 17, kind: input, shape index: {}]   ;;  %s2794_s18 = inlined_call_operand.vmem [shape: f32[1,128], index: 18, kind: input, shape index: {}]   ;;  %s2795_s19 = inlined_call_operand.hbm [shape: bf16[128,128], index: 19, kind: input, shape index: {}]   ;;  %s2796_s20 = inlined_call_operand.vmem [shape: f32[1,128], index: 20, kind: input, shape index: {}]   ;;  %s2797_s21 = inlined_call_operand.hbm [shape: bf16[128,128], index: 21, kind: input, shape index: {}]   ;;  %s2798_s22 = inlined_call_operand.vmem [shape: f32[1,128], index: 22, kind: input, shape index: {}]   ;;  %s2799_s23 = inlined_call_operand.hbm [shape: bf16[128,128], index: 23, kind: input, shape index: {}]   ;;  %s2800_s24 = inlined_call_operand.vmem [shape: f32[1,128], index: 24, kind: input, shape index: {}]   ;;  %s2801_s25 = inlined_call_operand.hbm [shape: f32[16,128], index: 25, kind: output, shape index: {0}]   ;;  %s2802_s26 = inlined_call_operand.hbm [shape: f32[1,128], index: 26, kind: output, shape index: {1}]  }
   0x1   :  { %2805 = sst [smem:[#allocation27_spill]] %s2776_s0 }
   0x2   :  { %2806 = sst [smem:[#allocation28_spill]] %s2777_s1 }
   0x3   :  { %2807 = sst [smem:[#allocation29_spill]] %s2778_s2 }
   0x4   :  { %2808 = sst [smem:[#allocation30_spill]] %s2779_s3 }
   0x5   :  { %2809 = sst [smem:[#allocation31_spill]] %s2780_s4 }
   0x6   :  { %2810 = sst [smem:[#allocation32_spill]] %s2781_s5 }
   0x7   :  { %2811 = sst [smem:[#allocation33_spill]] %s2782_s6 }
   0x8   :  { %2812 = sst [smem:[#allocation34_spill]] %s2783_s7 }
   0x9   :  { %2813 = sst [smem:[#allocation35_spill]] %s2784_s8 }
   0xa   :  { %2814 = sst [smem:[#allocation36_spill]] %s2785_s9 }
   0xb   :  { %2815 = sst [smem:[#allocation37_spill]] %s2786_s10 }
   0xc   :  { %32 = vsyncpa [#allocation3], 0 }
   0xd   :  { %33 = vsyncpa [#allocation6], 0 }
   0xe   :  { %34 = vsyncpa [#allocation9], 0 }
   0xf   :  { %35 = vsyncpa [#allocation12], 0 }
  0x10   :  { %36 = vsyncpa [#allocation15], 0 }
  0x11   :  { %37 = vsyncpa [#allocation4], 0 }
  0x12   :  { %38 = vsyncpa [#allocation19], 0  ;;  %s2375_s27 = smov [#allocation5]  }
  0x13   :  { %s60_s3 = sshll.u32 %s2375_s27, 4  ;;  %s61_s3 = int_to_ptr.vmem [resolvable:$true] %s60_s3 }
  0x14   :  { %s2149_s7 = scalar_lea.vmem %s61_s3, 1024  ;;  %p2154_p1 = scmp.lt.s32.totalorder %s61_s3, %s61_s3 }
  0x15   :  { %p2150_p0 = scmp.ne.s32.totalorder %s61_s3, %s2149_s7  ;;  %p2155_p2 = scmp.lt.s32.totalorder %s2149_s7, %s2149_s7 }
  0x17   :  { %p2156_p3 = por %p2155_p2, %p2154_p1 }
  0x19   :  { %p2157_p4 = pnand %p2156_p3, %p2150_p0 }
  0x1b   :  { %2160 = shalt.err (!%p2157_p4)
}
  0x1c   :  { %s2376_s28 = smov 64   ;;  %s2377_s8 = smov 4  }
  0x1d   :  { %s2816_s0 = sld [smem:[#allocation30_spill]]  ;;  %s2378_s9 = smov [#allocation8]  }
  0x1e   :  { %s96_s30 = sshll.u32 %s2378_s9, 4  ;;  %s2379_s2 = smov [#allocation11]   ;;  %s97_s30 = int_to_ptr.vmem [resolvable:$true] %s96_s30 }
  0x1f   :  { %s128_s5 = sshll.u32 %s2379_s2, 4  ;;  %s2169_s10 = scalar_lea.vmem %s97_s30, 1024  ;;  %s129_s5 = int_to_ptr.vmem [resolvable:$true] %s128_s5 }
  0x20   :  { %p2170_p5 = scmp.ne.s32.totalorder %s97_s30, %s2169_s10  ;;  %p2174_p6 = scmp.lt.s32.totalorder %s97_s30, %s97_s30 }
  0x21   :  { %p2175_p7 = scmp.lt.s32.totalorder %s2169_s10, %s2169_s10 }
  0x23   :  { %66 = dma.hbm_to_vmem [thread:$0]  %s2816_s0, 1024, %s61_s3, [#allocation6], %s2376_s28, %s2376_s28, %s2377_s8  }
  0x24   :  { %p2176_p8 = por %p2175_p7, %p2174_p6 }
  0x26   :  { %p2177_p9 = pnand %p2176_p8, %p2170_p5 }
  0x28   :  { %2180 = shalt.err (!%p2177_p9)
}
  0x29   :  { %102 = dma.hbm_to_vmem [thread:$0]  %s2787_s11, 1024, %s97_s30, [#allocation9], %s2376_s28, %s2376_s28, %s2377_s8  }
  0x2a   :  { %s2189_s27 = scalar_lea.vmem %s129_s5, 1024  ;;  %p2194_p11 = scmp.lt.s32.totalorder %s129_s5, %s129_s5 }
  0x2b   :  { %p2190_p10 = scmp.ne.s32.totalorder %s129_s5, %s2189_s27  ;;  %p2195_p12 = scmp.lt.s32.totalorder %s2189_s27, %s2189_s27 }
  0x2d   :  { %p2196_p13 = por %p2195_p12, %p2194_p11 }
  0x2f   :  { %p2197_p0 = pnand %p2196_p13, %p2190_p10 }
  0x31   :  { %2200 = shalt.err (!%p2197_p0)
}
  0x32   :  { %134 = dma.hbm_to_vmem [thread:$0]  %s2793_s17, 1024, %s129_s5, [#allocation12], %s2376_s28, %s2376_s28, %s2377_s8  }
  0x33   :  { %s2380_s4 = smov [#allocation14]   ;;  %s2381_s0 = smov [#allocation2]  }
  0x34   :  { %s156_s29 = sshll.u32 %s2380_s4, 4  ;;  %s46_s11 = sshll.u32 %s2381_s0, 4  ;;  %s157_s29 = int_to_ptr.vmem [resolvable:$true] %s156_s29  ;;  %s47_s11 = int_to_ptr.vmem [resolvable:$true] %s46_s11 }
  0x35   :  { %s2209_s9 = scalar_lea.vmem %s157_s29, 1024  ;;  %p2214_p2 = scmp.lt.s32.totalorder %s157_s29, %s157_s29 }
  0x36   :  { %p2210_p1 = scmp.ne.s32.totalorder %s157_s29, %s2209_s9  ;;  %p2215_p3 = scmp.lt.s32.totalorder %s2209_s9, %s2209_s9 }
  0x38   :  { %p2216_p4 = por %p2215_p3, %p2214_p2 }
  0x3a   :  { %p2217_p5 = pnand %p2216_p4, %p2210_p1 }
  0x3c   :  { %2220 = shalt.err (!%p2217_p5)
}
  0x3d   :  { %162 = dma.hbm_to_vmem [thread:$0]  %s2797_s21, 1024, %s157_s29, [#allocation15], %s2376_s28, %s2376_s28, %s2377_s8  }
  0x3e   :  { %s2229_s17 = scalar_lea.vmem %s47_s11, 256  ;;  %p2234_p7 = scmp.lt.s32.totalorder %s47_s11, %s47_s11 }
  0x3f   :  { %p2230_p6 = scmp.ne.s32.totalorder %s47_s11, %s2229_s17  ;;  %p2235_p8 = scmp.lt.s32.totalorder %s2229_s17, %s2229_s17 }
  0x41   :  { %p2236_p9 = por %p2235_p8, %p2234_p7 }
  0x43   :  { %p2237_p10 = pnand %p2236_p9, %p2230_p6 }
  0x45   :  { %2240 = shalt.err (!%p2237_p10)
}
  0x46   :  { %s2382_s5 = smov 128   ;;  %s2383_s10 = smov 8  }
  0x47   :  { %s2817_s27 = sld [smem:[#allocation28_spill]]  ;;  %s2384_s3 = smov [#allocation7]  }
  0x48   :  { %s78_s7 = sshll.u32 %s2384_s3, 4  ;;  %s2385_s21 = smov [#allocation10]   ;;  %s79_s7 = int_to_ptr.vmem [resolvable:$true] %s78_s7 }
  0x49   :  { %s114_s4 = sshll.u32 %s2385_s21, 4  ;;  %s2249_s29 = scalar_lea.vmem %s79_s7, 1024  ;;  %s115_s4 = int_to_ptr.vmem [resolvable:$true] %s114_s4 }
  0x4a   :  { %p2250_p11 = scmp.ne.s32.totalorder %s79_s7, %s2249_s29  ;;  %p2254_p12 = scmp.lt.s32.totalorder %s79_s7, %s79_s7 }
  0x4b   :  { %p2255_p13 = scmp.lt.s32.totalorder %s2249_s29, %s2249_s29 }
  0x4d   :  { %52 = dma.hbm_to_vmem [thread:$0]  %s2817_s27, 256, %s47_s11, [#allocation3], %s2382_s5, %s2382_s5, %s2383_s10  }
  0x4e   :  { %p2256_p0 = por %p2255_p13, %p2254_p12 }
  0x50   :  { %p2257_p1 = pnand %p2256_p0, %p2250_p11 }
  0x52   :  { %2260 = shalt.err (!%p2257_p1)
}
  0x53   :  { %s2818_s30 = sld [smem:[#allocation34_spill]]  ;;  %s2269_s11 = scalar_lea.vmem %s115_s4, 1024 }
  0x54   :  { %p2270_p2 = scmp.ne.s32.totalorder %s115_s4, %s2269_s11  ;;  %p2274_p3 = scmp.lt.s32.totalorder %s115_s4, %s115_s4 }
  0x55   :  { %p2275_p4 = scmp.lt.s32.totalorder %s2269_s11, %s2269_s11 }
  0x57   :  { %p2276_p5 = por %p2275_p4, %p2274_p3 }
  0x59   :  { %84 = dma.hbm_to_vmem [thread:$0]  %s2818_s30, 1024, %s79_s7, [#allocation6], %s2376_s28, %s2376_s28, %s2377_s8  }
  0x5a   :  { %p2277_p6 = pnand %p2276_p5, %p2270_p2 }
  0x5c   :  { %2280 = shalt.err (!%p2277_p6)
}
  0x5d   :  { %120 = dma.hbm_to_vmem [thread:$0]  %s2791_s15, 1024, %s115_s4, [#allocation9], %s2376_s28, %s2376_s28, %s2377_s8  }
  0x5e   :  { %s2386_s6 = smov [#allocation13]   ;;  %s2387_s27 = smov [#allocation16]  }
  0x5f   :  { %s142_s1 = sshll.u32 %s2386_s6, 4  ;;  %s170_s3 = sshll.u32 %s2387_s27, 4  ;;  %s143_s1 = int_to_ptr.vmem [resolvable:$true] %s142_s1  ;;  %s171_s3 = int_to_ptr.vmem [resolvable:$true] %s170_s3 }
  0x60   :  { %s2289_s7 = scalar_lea.vmem %s143_s1, 1024  ;;  %p2294_p8 = scmp.lt.s32.totalorder %s143_s1, %s143_s1 }
  0x61   :  { %p2290_p7 = scmp.ne.s32.totalorder %s143_s1, %s2289_s7  ;;  %p2295_p9 = scmp.lt.s32.totalorder %s2289_s7, %s2289_s7 }
  0x63   :  { %p2296_p10 = por %p2295_p9, %p2294_p8 }
  0x65   :  { %p2297_p11 = pnand %p2296_p10, %p2290_p7 }
  0x67   :  { %2300 = shalt.err (!%p2297_p11)
}
  0x68   :  { %148 = dma.hbm_to_vmem [thread:$0]  %s2795_s19, 1024, %s143_s1, [#allocation12], %s2376_s28, %s2376_s28, %s2377_s8  }
  0x69   :  { %s2309_s15 = scalar_lea.vmem %s171_s3, 1024  ;;  %p2314_p13 = scmp.lt.s32.totalorder %s171_s3, %s171_s3 }
  0x6a   :  { %p2310_p12 = scmp.ne.s32.totalorder %s171_s3, %s2309_s15  ;;  %p2315_p0 = scmp.lt.s32.totalorder %s2309_s15, %s2309_s15 }
  0x6c   :  { %p2316_p1 = por %p2315_p0, %p2314_p13 }
  0x6e   :  { %p2317_p2 = pnand %p2316_p1, %p2310_p12 }
  0x70   :  { %2320 = shalt.err (!%p2317_p2)
}
  0x71   :  { %176 = dma.hbm_to_vmem [thread:$0]  %s2799_s23, 1024, %s171_s3, [#allocation15], %s2376_s28, %s2376_s28, %s2377_s8  }
  0x72   :  { %2361 = dma.done.wait [#allocation3], 256  }
  0x73   :  { %2362 = vsyncadd [#allocation3], 4294967040 }
  0x74   :  { %2363 = dma.done.wait [#allocation6], 2048  }
  0x75   :  { %2364 = vsyncadd [#allocation6], 4294965248 }
  0x76   :  { %2365 = dma.done.wait [#allocation9], 2048  }
  0x77   :  { %2366 = vsyncadd [#allocation9], 4294965248 }
  0x78   :  { %2367 = dma.done.wait [#allocation12], 2048  }
  0x79   :  { %2368 = vsyncadd [#allocation12], 4294965248 }
  0x7a   :  { %2369 = dma.done.wait [#allocation15], 2048  }
  0x7b   :  { %2370 = vsyncadd [#allocation15], 4294965248  ;;  %v2388_v0 = vmov 0.0   ;;  %vm2389_vm0 = vmmov 0   ;;  %v2053_v1 = vld [vmem:[#allocation5 + $0x38] sm:$0xff]   ;;  %v2054_v2 = vld [vmem:[#allocation5 + $0x30] sm:$0xff]   ;;  %v405_v21 = vlaneseq }
  0x7c   :  { %1834 = vmatprep.subr.bf16.mxu0 %v2388_v0  ;;  %1850 = vmatprep.mubr.msk.bf16.mxu0 %vm2389_vm0, %v2388_v0  ;;  %v2055_v3 = vld [vmem:[#allocation5 + $0x28] sm:$0xff]   ;;  %v2056_v4 = vld [vmem:[#allocation5 + $0x20] sm:$0xff]   ;;  %v2057_v5 = vld [vmem:[#allocation5 + $0x18] sm:$0xff]   ;;  %s2819_s28 = sld [smem:[#allocation27_spill]]  ;;  %vm419_vm3 = vcmask 130048  }
  0x7d   :  { %1861 = vmatprep.subr.bf16.mxu1 %v2388_v0  ;;  %1863 = vmatprep.mubr.msk.bf16.mxu1 %vm2389_vm0, %v2388_v0  ;;  %v2058_v6 = vld [vmem:[#allocation5 + $0x10] sm:$0xff]   ;;  %v2059_v7 = vld [vmem:[#allocation5 + $0x8] sm:$0xff]   ;;  %v2060_v8 = vld [vmem:[#allocation5] sm:$0xff]   ;;  %s2820_s2 = sld [smem:[#allocation32_spill]]  ;;  %v406_v22 = vshrl.u32 %v405_v21, 7 }
  0x7e   :  { %1835 = vmatpush3.bf16.msra.mxu0 %v2053_v1  ;;  %s2821_s1 = sld [smem:[#allocation31_spill]]  ;;  %v207_v25 = vld [vmem:[#allocation2] sm:$0xff]  ;;  %v208_v26 = vld [vmem:[#allocation2 + $0x8] sm:$0xff]  ;;  %v2063_v1 = vld [vmem:[#allocation7 + $0x28] sm:$0xff]  }
  0x7f   :  { %1836 = vmatprep.subr.bf16.mxu0 %v2388_v0  ;;  %v2615_v24 = vsub.s32 0, %v406_v22  ;;  %v1671_v28 = vadd.f32 -1.0, %v207_v25  ;;  %v1672_v32 = vadd.f32 -1.0, %v208_v26  ;;  %v2061_v61 = vld [vmem:[#allocation7 + $0x38] sm:$0xff]   ;;  %v2062_v63 = vld [vmem:[#allocation7 + $0x30] sm:$0xff]   ;;  %s2822_s7 = sld [smem:[#allocation33_spill]] }
  0x80   :  { %s2823_s15 = sld [smem:[#allocation36_spill]] }
  0x81   :  { %v2618_v35 = vmul.f32 1e+09, %v1671_v28  ;;  %v2620_v38 = vmul.f32 1e+09, %v1672_v32  ;;  %s2824_s19 = sld [smem:[#allocation35_spill]] }
  0x82   :  { %1837 = vmatpush3.bf16.msra.mxu0 %v2054_v2  ;;  %v213_v9 = vld [vmem:[%s2819_s28] sm:$0xff]  ;;  %v214_v10 = vld [vmem:[%s2819_s28 + $0x8] sm:$0xff]  ;;  %v2064_v2 = vld [vmem:[#allocation7 + $0x20] sm:$0xff]   ;;  %s2825_s8 = sld [smem:[#allocation37_spill]] }
  0x83   :  { %1838 = vmatprep.subr.bf16.mxu0 %v2388_v0  ;;  %v215_v11 = vpack.c.bf16 %v214_v10, %v213_v9  ;;  %v1681_v12 = vld [vmem:[%s2820_s2] ss:$0 sm:$0xff]  ;;  %s2826_s17 = sld [smem:[#allocation29_spill]] }
  0x84   :  { %v334_v20 = vld [vmem:[%s2821_s1] sm:$0x1] }
  0x86   :  { %1839 = vmatpush3.bf16.msra.mxu0 %v2055_v3  ;;  %v2065_v3 = vld [vmem:[#allocation7 + $0x18] sm:$0xff]  }
  0x87   :  { %1840 = vmatprep.subr.bf16.mxu0 %v2388_v0 }
  0x8a   :  { %1841 = vmatpush3.bf16.msra.mxu0 %v2056_v4  ;;  %v2066_v4 = vld [vmem:[#allocation7 + $0x10] sm:$0xff]  }
  0x8b   :  { %1842 = vmatprep.subr.bf16.mxu0 %v2388_v0 }
  0x8e   :  { %1843 = vmatpush3.bf16.msra.mxu0 %v2057_v5  ;;  %v2067_v5 = vld [vmem:[#allocation7 + $0x8] sm:$0xff]  }
  0x8f   :  { %1844 = vmatprep.subr.bf16.mxu0 %v2388_v0 }
  0x92   :  { %1845 = vmatpush3.bf16.msra.mxu0 %v2058_v6  ;;  %v2068_v6 = vld [vmem:[#allocation7] sm:$0xff]  }
  0x93   :  { %1846 = vmatprep.subr.bf16.mxu0 %v2388_v0 }
  0x96   :  { %1847 = vmatpush3.bf16.msra.mxu0 %v2059_v7  ;;  %v1682_v7 = vld [vmem:[%s2822_s7] ss:$0 sm:$0xff] }
  0x97   :  { %1848 = vmatprep.subr.bf16.mxu0 %v2388_v0 }
  0x9a   :  { %1849 = vmatpush3.bf16.msra.mxu0 %v2060_v8 }
  0x9b   :  { %1854 = vmatprep.subr.mxu0 %v2388_v0 }
  0x9d   :  { %1851 = vmatmul.mubr.bf16.vlgmr.msra.gmra.mxu0 %v215_v11 }
  0x9e   :  { %1858 = vmatprep.mubr.msk.f32.mxu0 %vm2389_vm0, %v2388_v0 }
 0x15d   :  { %v314_v13 = vpop.f32.mrf.mxu0 }
 0x15e   :  { %v328_v14 = vmul.f32 %v1681_v12, %v314_v13 }
 0x15f   :  { %v1852_v15 = vpop.f32.mrf.mxu0 }
 0x160   :  { %330 = vadd.xlane.f32.xlu0 %v328_v14 }
 0x161   :  { %v317_v16 = vpop.f32.mrf.mxu0 }
 0x162   :  { %1855 = vmatpush3.xpose.msra.mxu0 %v317_v16  ;;  %v443_v17 = vpack.c.bf16 %v317_v16, %v314_v13  ;;  %v329_v18 = vmul.f32 %v1681_v12, %v317_v16 }
 0x163   :  { %v1853_v19 = vpop.f32.mrf.mxu0  ;;  %1856 = vmatprep.subr.mxu0 %v2388_v0 }
 0x164   :  { %1862 = vmatpush3.bf16.msra.mxu1 %v443_v17  ;;  %332 = vadd.xlane.f32.xlu0 %v329_v18  ;;  %v1692_v19 = vld [vmem:[%s2823_s15] ss:$0 sm:$0xff] }
 0x165   :  { %1867 = vmatprep.subr.bf16.mxu1 %v2388_v0 }
 0x166   :  { %1857 = vmatpush3.xpose.msra.mxu0 %v314_v13 }
 0x167   :  { %1887 = vmatprep.subr.mxu0 %v2388_v0 }
 0x169   :  { %1859 = vmatmul.mubr.f32.vlgmr.msra.gmra.mxu0 %v334_v20 }
 0x16a   :  { %1891 = vmatprep.mubr.msk.f32.mxu0 %vm2389_vm0, %v2388_v0 }
 0x1e9   :  { %v331_v23 = vpop.xlane.xlu0 %330 }
 0x1ed   :  { %v333_v30 = vpop.xlane.xlu0 %332 }
 0x229   :  { %v401_v27 = vpop.f32.mrf.mxu0 }
 0x22a   :  { %v408_v29 = vrot.slane %v401_v27, %v2615_v24  ;;  %v620_v27 = vld [vmem:[%s2824_s19] sm:$0x1] }
 0x22b   :  { %v1860_v31 = vpop.f32.mrf.mxu0 }
 0x22c   :  { %v409_v33 = vadd.f32 %v408_v29, %v331_v23  ;;  %v410_v34 = vadd.f32 %v408_v29, %v333_v30 }
 0x22e   :  { %v413_v36 = vmul.f32 0.2, %v409_v33  ;;  %v414_v37 = vmul.f32 0.2, %v410_v34  ;;  %vm411_vm1 = vcmp.gt.f32.partialorder %v409_v33, 0.0  ;;  %vm412_vm2 = vcmp.gt.f32.partialorder %v410_v34, 0.0 }
 0x230   :  { %v415_v39 = vsel %vm411_vm1, %v409_v33, %v413_v36  ;;  %v416_v40 = vsel %vm412_vm2, %v410_v34, %v414_v37 }
 0x231   :  { %v417_v41 = vadd.f32 %v415_v39, %v2618_v35  ;;  %v418_v43 = vadd.f32 %v416_v40, %v2620_v38 }
 0x233   :  { %v420_v42 = vsel %vm419_vm3, %v417_v41, -inf  ;;  %v423_v44 = vsel %vm419_vm3, %v418_v43, -inf }
 0x234   :  { %421 = vmax.xlane.f32.xlu1 %v420_v42 }
 0x238   :  { %424 = vmax.xlane.f32.xlu1 %v423_v44 }
 0x2bd   :  { %v422_v45 = vpop.xlane.xlu1 %421 }
 0x2be   :  { %v426_v46 = vsub.f32 %v417_v41, %v422_v45 }
 0x2c0   :  { %v428_v47 = vmul.f32 1.442695, %v426_v46 }
 0x2c1   :  { %v425_v48 = vpop.xlane.xlu1 %424 }
 0x2c2   :  { %2117 = vpow2.f32 %v428_v47  ;;  %v427_v49 = vsub.f32 %v418_v43, %v425_v48 }
 0x2c4   :  { %v430_v50 = vmul.f32 1.442695, %v427_v49 }
 0x2c6   :  { %2119 = vpow2.f32 %v430_v50 }
 0x2cf   :  { %v2118_v51 = vpop.eup %2117 }
 0x2d0   :  { %v432_v52 = vsel %vm419_vm3, %v2118_v51, 0.0 }
 0x2d1   :  { %433 = vadd.xlane.f32.xlu0 %v432_v52 }
 0x2d3   :  { %v2120_v53 = vpop.eup %2119 }
 0x2d4   :  { %v435_v54 = vsel %vm419_vm3, %v2120_v53, 0.0 }
 0x2d5   :  { %436 = vadd.xlane.f32.xlu1 %v435_v54 }
 0x35a   :  { %v434_v55 = vpop.xlane.xlu0 %433 }
 0x35b   :  { %2121 = vrcp.f32 %v434_v55 }
 0x35e   :  { %v437_v56 = vpop.xlane.xlu1 %436 }
 0x35f   :  { %2123 = vrcp.f32 %v437_v56 }
 0x368   :  { %v2122_v57 = vpop.eup %2121 }
 0x369   :  { %v440_v59 = vmul.f32 %v2122_v57, %v2118_v51 }
 0x36c   :  { %v2124_v58 = vpop.eup %2123 }
 0x36d   :  { %v441_v60 = vmul.f32 %v2124_v58, %v2120_v53 }
 0x36f   :  { %v442_v62 = vpack.c.bf16 %v441_v60, %v440_v59 }
 0x371   :  { %1864 = vmatmul.mubr.msk.bf16.vlgmr.msra.gmra.mxu1 %vm419_vm3, %v442_v62  ;;  %v2069_v62 = vld [vmem:[#allocation8 + $0x38] sm:$0xff]  }
 0x372   :  { %1868 = vmatpush3.bf16.msra.mxu1 %v2061_v61  ;;  %1883 = vmatprep.mubr.msk.bf16.mxu1 %vm2389_vm0, %v2388_v0 }
 0x373   :  { %1869 = vmatprep.subr.bf16.mxu1 %v2388_v0 }
 0x376   :  { %1870 = vmatpush3.bf16.msra.mxu1 %v2062_v63 }
 0x377   :  { %1871 = vmatprep.subr.bf16.mxu1 %v2388_v0 }
 0x37a   :  { %1872 = vmatpush3.bf16.msra.mxu1 %v2063_v1  ;;  %v2070_v1 = vld [vmem:[#allocation8 + $0x30] sm:$0xff]  }
 0x37b   :  { %1873 = vmatprep.subr.bf16.mxu1 %v2388_v0 }
 0x37e   :  { %1874 = vmatpush3.bf16.msra.mxu1 %v2064_v2  ;;  %v2071_v2 = vld [vmem:[#allocation8 + $0x28] sm:$0xff]  }
 0x37f   :  { %1875 = vmatprep.subr.bf16.mxu1 %v2388_v0 }
 0x382   :  { %1876 = vmatpush3.bf16.msra.mxu1 %v2065_v3  ;;  %v2072_v3 = vld [vmem:[#allocation8 + $0x20] sm:$0xff]  }
 0x383   :  { %1877 = vmatprep.subr.bf16.mxu1 %v2388_v0 }
 0x386   :  { %1878 = vmatpush3.bf16.msra.mxu1 %v2066_v4  ;;  %v2073_v4 = vld [vmem:[#allocation8 + $0x18] sm:$0xff]  }
 0x387   :  { %1879 = vmatprep.subr.bf16.mxu1 %v2388_v0 }
 0x38a   :  { %1880 = vmatpush3.bf16.msra.mxu1 %v2067_v5  ;;  %v2074_v5 = vld [vmem:[#allocation8 + $0x10] sm:$0xff]  }
 0x38b   :  { %1881 = vmatprep.subr.bf16.mxu1 %v2388_v0 }
 0x38e   :  { %1882 = vmatpush3.bf16.msra.mxu1 %v2068_v6  ;;  %v2075_v6 = vld [vmem:[#allocation8 + $0x8] sm:$0xff]  }
 0x38f   :  { %1920 = vmatprep.subr.mxu1 %v2388_v0 }
 0x431   :  { %v488_v8 = vpop.f32.mrf.mxu1 }
 0x432   :  { %v489_v9 = vadd.f32 %v1682_v7, %v488_v8  ;;  %v1693_v8 = vld [vmem:[%s2825_s8] ss:$0 sm:$0xff] }
 0x433   :  { %v1865_v10 = vpop.f32.mrf.mxu1 }
 0x434   :  { %v497_v12 = vmul.f32 0.01, %v489_v9  ;;  %vm495_vm4 = vcmp.gt.f32.partialorder %v489_v9, 0.0 }
 0x435   :  { %v491_v11 = vpop.f32.mrf.mxu1 }
 0x436   :  { %v492_v13 = vadd.f32 %v1682_v7, %v491_v11  ;;  %v499_v16 = vsel %vm495_vm4, %v489_v9, %v497_v12  ;;  %v2076_v7 = vld [vmem:[#allocation8] sm:$0xff]  }
 0x437   :  { %v1866_v14 = vpop.f32.mrf.mxu1 }
 0x438   :  { %vm496_vm5 = vcmp.gt.f32.partialorder %v492_v13, 0.0  ;;  %v498_v15 = vmul.f32 0.01, %v492_v13 }
 0x43a   :  { %v500_v17 = vsel %vm496_vm5, %v492_v13, %v498_v15 }
 0x43b   :  { %v501_v18 = vpack.c.bf16 %v500_v17, %v499_v16 }
 0x43d   :  { %1884 = vmatmul.mubr.bf16.vlgmr.msra.gmra.mxu1 %v501_v18 }
 0x43e   :  { %1924 = vmatprep.mubr.msk.f32.mxu1 %vm2389_vm0, %v2388_v0 }
 0x4fd   :  { %v600_v20 = vpop.f32.mrf.mxu1 }
 0x4fe   :  { %v614_v21 = vmul.f32 %v1692_v19, %v600_v20 }
 0x4ff   :  { %v1885_v22 = vpop.f32.mrf.mxu1 }
 0x500   :  { %616 = vadd.xlane.f32.xlu0 %v614_v21 }
 0x501   :  { %v603_v23 = vpop.f32.mrf.mxu1 }
 0x502   :  { %1888 = vmatpush3.xpose.msra.mxu0 %v603_v23  ;;  %v615_v25 = vmul.f32 %v1692_v19, %v603_v23  ;;  %v728_v28 = vpack.c.bf16 %v603_v23, %v600_v20 }
 0x503   :  { %v1886_v26 = vpop.f32.mrf.mxu1  ;;  %1889 = vmatprep.subr.mxu0 %v2388_v0 }
 0x504   :  { %618 = vadd.xlane.f32.xlu1 %v615_v25 }
 0x506   :  { %1890 = vmatpush3.xpose.msra.mxu0 %v600_v20  ;;  %v1703_v20 = vld [vmem:[%s2789_s13] ss:$0 sm:$0xff] }
 0x507   :  { %1894 = vmatprep.subr.bf16.mxu0 %v2388_v0 }
 0x509   :  { %1892 = vmatmul.mubr.f32.vlgmr.msra.gmra.mxu0 %v620_v27 }
 0x50a   :  { %1895 = vmatpush3.bf16.msra.mxu0 %v728_v28  ;;  %1896 = vmatprep.mubr.msk.bf16.mxu0 %vm2389_vm0, %v2388_v0  ;;  %v905_v28 = vld [vmem:[%s2788_s12] sm:$0x1] }
 0x50b   :  { %1900 = vmatprep.subr.bf16.mxu0 %v2388_v0 }
 0x589   :  { %v617_v30 = vpop.xlane.xlu0 %616 }
 0x58d   :  { %v619_v32 = vpop.xlane.xlu1 %618 }
 0x5c9   :  { %v687_v29 = vpop.f32.mrf.mxu0 }
 0x5ca   :  { %v694_v31 = vrot.slane %v687_v29, %v2615_v24 }
 0x5cb   :  { %v1893_v33 = vpop.f32.mrf.mxu0 }
 0x5cc   :  { %v695_v34 = vadd.f32 %v694_v31, %v617_v30  ;;  %v696_v36 = vadd.f32 %v694_v31, %v619_v32 }
 0x5ce   :  { %v699_v37 = vmul.f32 0.2, %v695_v34  ;;  %v700_v39 = vmul.f32 0.2, %v696_v36  ;;  %vm697_vm6 = vcmp.gt.f32.partialorder %v695_v34, 0.0  ;;  %vm698_vm7 = vcmp.gt.f32.partialorder %v696_v36, 0.0 }
 0x5d0   :  { %v701_v40 = vsel %vm697_vm6, %v695_v34, %v699_v37  ;;  %v702_v41 = vsel %vm698_vm7, %v696_v36, %v700_v39 }
 0x5d1   :  { %v703_v42 = vadd.f32 %v701_v40, %v2618_v35  ;;  %v704_v43 = vadd.f32 %v702_v41, %v2620_v38 }
 0x5d3   :  { %v705_v44 = vsel %vm419_vm3, %v703_v42, -inf  ;;  %v708_v45 = vsel %vm419_vm3, %v704_v43, -inf }
 0x5d4   :  { %706 = vmax.xlane.f32.xlu0 %v705_v44  ;;  %709 = vmax.xlane.f32.xlu1 %v708_v45 }
 0x65d   :  { %v707_v46 = vpop.xlane.xlu0 %706  ;;  %v710_v47 = vpop.xlane.xlu1 %709 }
 0x65e   :  { %v711_v48 = vsub.f32 %v703_v42, %v707_v46  ;;  %v712_v49 = vsub.f32 %v704_v43, %v710_v47 }
 0x660   :  { %v713_v50 = vmul.f32 1.442695, %v711_v48  ;;  %v715_v51 = vmul.f32 1.442695, %v712_v49 }
 0x662   :  { %2125 = vpow2.f32 %v713_v50 }
 0x663   :  { %2127 = vpow2.f32 %v715_v51 }
 0x66f   :  { %v2126_v52 = vpop.eup %2125 }
 0x670   :  { %v2128_v53 = vpop.eup %2127  ;;  %v717_v54 = vsel %vm419_vm3, %v2126_v52, 0.0 }
 0x671   :  { %718 = vadd.xlane.f32.xlu0 %v717_v54  ;;  %v720_v55 = vsel %vm419_vm3, %v2128_v53, 0.0  ;;  %v1186_v54 = vld [vmem:[%s2826_s17] sm:$0xff] }
 0x672   :  { %721 = vadd.xlane.f32.xlu1 %v720_v55  ;;  %v1187_v55 = vld [vmem:[%s2826_s17 + $0x8] sm:$0xff] }
 0x6fa   :  { %v719_v56 = vpop.xlane.xlu0 %718 }
 0x6fb   :  { %2129 = vrcp.f32 %v719_v56  ;;  %v722_v57 = vpop.xlane.xlu1 %721  ;;  %v2390_v56 = vmov 0  }
 0x6fc   :  { %2131 = vrcp.f32 %v722_v57  ;;  %2051 = vset.pattern.permute.xlu0 %v2390_v56  ;;  %2052 = vset.pattern.permute.xlu1 %v2390_v56  ;;  %v2082_v57 = vld [vmem:[#allocation11 + $0x38] sm:$0xff]  }
 0x708   :  { %v2130_v58 = vpop.eup %2129 }
 0x709   :  { %v2132_v59 = vpop.eup %2131  ;;  %v725_v60 = vmul.f32 %v2130_v58, %v2126_v52 }
 0x70a   :  { %v726_v61 = vmul.f32 %v2132_v59, %v2128_v53 }
 0x70c   :  { %v727_v63 = vpack.c.bf16 %v726_v61, %v725_v60 }
 0x70e   :  { %1897 = vmatmul.mubr.msk.bf16.vlgmr.msra.gmra.mxu0 %vm419_vm3, %v727_v63 }
 0x70f   :  { %1901 = vmatpush3.bf16.msra.mxu0 %v2069_v62  ;;  %1916 = vmatprep.mubr.msk.bf16.mxu0 %vm2389_vm0, %v2388_v0 }
 0x710   :  { %1902 = vmatprep.subr.bf16.mxu0 %v2388_v0 }
 0x713   :  { %1903 = vmatpush3.bf16.msra.mxu0 %v2070_v1  ;;  %v2077_v1 = vld [vmem:[#allocation10 + $0x38] sm:$0xff]  }
 0x714   :  { %1904 = vmatprep.subr.bf16.mxu0 %v2388_v0 }
 0x717   :  { %1905 = vmatpush3.bf16.msra.mxu0 %v2071_v2 }
 0x718   :  { %1906 = vmatprep.subr.bf16.mxu0 %v2388_v0 }
 0x71b   :  { %1907 = vmatpush3.bf16.msra.mxu0 %v2072_v3  ;;  %v2078_v3 = vld [vmem:[#allocation10 + $0x30] sm:$0xff]  }
 0x71c   :  { %1908 = vmatprep.subr.bf16.mxu0 %v2388_v0 }
 0x71f   :  { %1909 = vmatpush3.bf16.msra.mxu0 %v2073_v4  ;;  %v2079_v4 = vld [vmem:[#allocation10 + $0x28] sm:$0xff]  }
 0x720   :  { %1910 = vmatprep.subr.bf16.mxu0 %v2388_v0 }
 0x723   :  { %1911 = vmatpush3.bf16.msra.mxu0 %v2074_v5  ;;  %v2080_v5 = vld [vmem:[#allocation10 + $0x20] sm:$0xff]  }
 0x724   :  { %1912 = vmatprep.subr.bf16.mxu0 %v2388_v0 }
 0x727   :  { %1913 = vmatpush3.bf16.msra.mxu0 %v2075_v6  ;;  %v2081_v6 = vld [vmem:[#allocation10 + $0x18] sm:$0xff]  }
 0x728   :  { %1914 = vmatprep.subr.bf16.mxu0 %v2388_v0 }
 0x72b   :  { %1915 = vmatpush3.bf16.msra.mxu0 %v2076_v7  ;;  %v2083_v7 = vld [vmem:[#allocation10 + $0x10] sm:$0xff]  }
 0x72c   :  { %1953 = vmatprep.subr.bf16.mxu0 %v2388_v0 }
 0x7ce   :  { %v773_v9 = vpop.f32.mrf.mxu0 }
 0x7cf   :  { %v774_v10 = vadd.f32 %v1693_v8, %v773_v9  ;;  %v2085_v9 = vld [vmem:[#allocation10 + $0x8] sm:$0xff]  }
 0x7d0   :  { %v1898_v11 = vpop.f32.mrf.mxu0 }
 0x7d1   :  { %v782_v13 = vmul.f32 0.01, %v774_v10  ;;  %vm780_vm8 = vcmp.gt.f32.partialorder %v774_v10, 0.0  ;;  %v2087_v11 = vld [vmem:[#allocation11 + $0x20] sm:$0xff]  }
 0x7d2   :  { %v776_v12 = vpop.f32.mrf.mxu0 }
 0x7d3   :  { %v777_v14 = vadd.f32 %v1693_v8, %v776_v12  ;;  %v784_v17 = vsel %vm780_vm8, %v774_v10, %v782_v13  ;;  %v2084_v8 = vld [vmem:[#allocation11 + $0x30] sm:$0xff]   ;;  %v2086_v10 = vld [vmem:[#allocation11 + $0x28] sm:$0xff]   ;;  %v2088_v12 = vld [vmem:[#allocation10] sm:$0xff]  }
 0x7d4   :  { %v1899_v15 = vpop.f32.mrf.mxu0  ;;  %v2089_v13 = vld [vmem:[#allocation11 + $0x18] sm:$0xff]  }
 0x7d5   :  { %vm781_vm9 = vcmp.gt.f32.partialorder %v777_v14, 0.0  ;;  %v783_v16 = vmul.f32 0.01, %v777_v14  ;;  %v2091_v15 = vld [vmem:[#allocation11 + $0x8] sm:$0xff]  }
 0x7d7   :  { %v785_v18 = vsel %vm781_vm9, %v777_v14, %v783_v16  ;;  %v2090_v14 = vld [vmem:[#allocation11 + $0x10] sm:$0xff]   ;;  %v2092_v16 = vld [vmem:[#allocation11] sm:$0xff]  }
 0x7d8   :  { %v786_v19 = vpack.c.bf16 %v785_v18, %v784_v17  ;;  %v1704_v17 = vld [vmem:[%s2790_s14] ss:$0 sm:$0xff] }
 0x7da   :  { %1917 = vmatmul.mubr.bf16.vlgmr.msra.gmra.mxu0 %v786_v19 }
 0x7db   :  { %1969 = vmatprep.mubr.msk.bf16.mxu0 %vm2389_vm0, %v2388_v0  ;;  %1954 = vmatpush3.bf16.msra.mxu0 %v2082_v57 }
 0x7dc   :  { %1955 = vmatprep.subr.bf16.mxu0 %v2388_v0 }
 0x7df   :  { %1956 = vmatpush3.bf16.msra.mxu0 %v2084_v8  ;;  %v2108_v8 = vld [vmem:[#allocation14] sm:$0xff]  }
 0x7e0   :  { %1957 = vmatprep.subr.bf16.mxu0 %v2388_v0 }
 0x7e3   :  { %1958 = vmatpush3.bf16.msra.mxu0 %v2086_v10  ;;  %v2110_v10 = vld [vmem:[#allocation16 + $0x30] sm:$0xff]  }
 0x7e4   :  { %1959 = vmatprep.subr.bf16.mxu0 %v2388_v0 }
 0x7e7   :  { %1960 = vmatpush3.bf16.msra.mxu0 %v2087_v11  ;;  %v2111_v11 = vld [vmem:[#allocation16 + $0x28] sm:$0xff]  }
 0x7e8   :  { %1961 = vmatprep.subr.bf16.mxu0 %v2388_v0 }
 0x7eb   :  { %1962 = vmatpush3.bf16.msra.mxu0 %v2089_v13  ;;  %v2113_v13 = vld [vmem:[#allocation16 + $0x18] sm:$0xff]  }
 0x7ec   :  { %1963 = vmatprep.subr.bf16.mxu0 %v2388_v0 }
 0x7ef   :  { %1964 = vmatpush3.bf16.msra.mxu0 %v2090_v14  ;;  %v2114_v14 = vld [vmem:[#allocation16 + $0x10] sm:$0xff]  }
 0x7f0   :  { %1965 = vmatprep.subr.bf16.mxu0 %v2388_v0 }
 0x7f3   :  { %1966 = vmatpush3.bf16.msra.mxu0 %v2091_v15  ;;  %v1331_v15 = vld [vmem:[%s2796_s20] sm:$0x1]  ;;  %s2391_s20 = smov [#allocation17]  }
 0x7f4   :  { %1967 = vmatprep.subr.bf16.mxu0 %v2388_v0  ;;  %s1641_s0 = sshll.u32 %s2391_s20, 4  ;;  %s1642_s0 = int_to_ptr.vmem [resolvable:$true] %s1641_s0 }
 0x7f5   :  { %s2321_s19 = scalar_lea.vmem %s1642_s0, 256  ;;  %p2326_p4 = scmp.lt.s32.totalorder %s1642_s0, %s1642_s0 }
 0x7f6   :  { %p2322_p3 = scmp.ne.s32.totalorder %s1642_s0, %s2321_s19  ;;  %p2327_p5 = scmp.lt.s32.totalorder %s2321_s19, %s2321_s19 }
 0x7f7   :  { %1968 = vmatpush3.bf16.msra.mxu0 %v2092_v16 }
 0x7f8   :  { %1993 = vmatprep.subr.bf16.mxu0 %v2388_v0  ;;  %p2328_p6 = por %p2327_p5, %p2326_p4 }
 0x7fa   :  { %p2329_p7 = pnand %p2328_p6, %p2322_p3 }
 0x89a   :  { %v885_v21 = vpop.f32.mrf.mxu0 }
 0x89b   :  { %v899_v22 = vmul.f32 %v1703_v20, %v885_v21 }
 0x89c   :  { %v1918_v23 = vpop.f32.mrf.mxu0 }
 0x89d   :  { %901 = vadd.xlane.f32.xlu0 %v899_v22 }
 0x89e   :  { %v888_v25 = vpop.f32.mrf.mxu0 }
 0x89f   :  { %1921 = vmatpush3.xpose.msra.mxu1 %v888_v25  ;;  %v900_v26 = vmul.f32 %v1703_v20, %v888_v25  ;;  %v1013_v29 = vpack.c.bf16 %v888_v25, %v885_v21 }
 0x8a0   :  { %v1919_v27 = vpop.f32.mrf.mxu0  ;;  %1922 = vmatprep.subr.mxu1 %v2388_v0 }
 0x8a1   :  { %903 = vadd.xlane.f32.xlu1 %v900_v26 }
 0x8a3   :  { %1923 = vmatpush3.xpose.msra.mxu1 %v885_v21 }
 0x8a4   :  { %1927 = vmatprep.subr.bf16.mxu1 %v2388_v0 }
 0x8a6   :  { %1925 = vmatmul.mubr.f32.vlgmr.msra.gmra.mxu1 %v905_v28 }
 0x8a7   :  { %1928 = vmatpush3.bf16.msra.mxu1 %v1013_v29  ;;  %1929 = vmatprep.mubr.msk.bf16.mxu1 %vm2389_vm0, %v2388_v0 }
 0x8a8   :  { %1933 = vmatprep.subr.bf16.mxu1 %v2388_v0 }
 0x926   :  { %v902_v31 = vpop.xlane.xlu0 %901 }
 0x92a   :  { %v904_v33 = vpop.xlane.xlu1 %903 }
 0x966   :  { %v972_v30 = vpop.f32.mrf.mxu1 }
 0x967   :  { %v979_v32 = vrot.slane %v972_v30, %v2615_v24 }
 0x968   :  { %v1926_v34 = vpop.f32.mrf.mxu1 }
 0x969   :  { %v980_v36 = vadd.f32 %v979_v32, %v902_v31  ;;  %v981_v37 = vadd.f32 %v979_v32, %v904_v33  ;;  %v2093_v31 = vld [vmem:[#allocation13 + $0x38] sm:$0xff]  }
 0x96b   :  { %v984_v39 = vmul.f32 0.2, %v980_v36  ;;  %v985_v40 = vmul.f32 0.2, %v981_v37  ;;  %vm983_vm10 = vcmp.gt.f32.partialorder %v981_v37, 0.0  ;;  %vm982_vm11 = vcmp.gt.f32.partialorder %v980_v36, 0.0 }
 0x96d   :  { %v987_v41 = vsel %vm983_vm10, %v981_v37, %v985_v40  ;;  %v986_v42 = vsel %vm982_vm11, %v980_v36, %v984_v39  ;;  %v2094_v37 = vld [vmem:[#allocation13 + $0x30] sm:$0xff]  }
 0x96e   :  { %v989_v43 = vadd.f32 %v987_v41, %v2620_v38  ;;  %v988_v44 = vadd.f32 %v986_v42, %v2618_v35 }
 0x970   :  { %v993_v45 = vsel %vm419_vm3, %v989_v43, -inf  ;;  %v990_v46 = vsel %vm419_vm3, %v988_v44, -inf }
 0x971   :  { %994 = vmax.xlane.f32.xlu1 %v993_v45  ;;  %991 = vmax.xlane.f32.xlu0 %v990_v46  ;;  %v2095_v46 = vld [vmem:[#allocation13 + $0x28] sm:$0xff]  }
 0x9fa   :  { %v995_v24 = vpop.xlane.xlu1 %994  ;;  %v992_v47 = vpop.xlane.xlu0 %991 }
 0x9fb   :  { %v997_v48 = vsub.f32 %v989_v43, %v995_v24  ;;  %v996_v49 = vsub.f32 %v988_v44, %v992_v47  ;;  %v2096_v24 = vld [vmem:[#allocation13 + $0x20] sm:$0xff]   ;;  %v2097_v47 = vld [vmem:[#allocation13 + $0x18] sm:$0xff]  }
 0x9fd   :  { %v1000_v50 = vmul.f32 1.442695, %v997_v48  ;;  %v998_v51 = vmul.f32 1.442695, %v996_v49  ;;  %v2098_v48 = vld [vmem:[#allocation13 + $0x10] sm:$0xff]   ;;  %v2099_v49 = vld [vmem:[#allocation13 + $0x8] sm:$0xff]  }
 0x9ff   :  { %2133 = vpow2.f32 %v1000_v50  ;;  %v2100_v50 = vld [vmem:[#allocation13] sm:$0xff]  }
 0xa00   :  { %2135 = vpow2.f32 %v998_v51  ;;  %v2101_v51 = vld [vmem:[#allocation14 + $0x38] sm:$0xff]  }
 0xa0c   :  { %v2134_v52 = vpop.eup %2133 }
 0xa0d   :  { %v2136_v53 = vpop.eup %2135  ;;  %v1005_v38 = vsel %vm419_vm3, %v2134_v52, 0.0 }
 0xa0e   :  { %1006 = vadd.xlane.f32.xlu1 %v1005_v38  ;;  %v1002_v35 = vsel %vm419_vm3, %v2136_v53, 0.0  ;;  %v2104_v38 = vld [vmem:[#allocation14 + $0x20] sm:$0xff]  }
 0xa0f   :  { %1003 = vadd.xlane.f32.xlu0 %v1002_v35  ;;  %v2105_v35 = vld [vmem:[#allocation14 + $0x18] sm:$0xff]  }
 0xa1f   :  { %1195 = vperm.xlu1 %2052, %v1187_v55   ;;  %v1706_v55 = vld [vmem:[%s2792_s16] ss:$0 sm:$0xff] }
 0xa25   :  { %1190 = vperm.xlu0 %2051, %v1186_v54   ;;  %v2106_v54 = vld [vmem:[#allocation14 + $0x10] sm:$0xff]  }
 0xa97   :  { %v1007_v58 = vpop.xlane.xlu1 %1006 }
 0xa98   :  { %2137 = vrcp.f32 %v1007_v58  ;;  %v1004_v59 = vpop.xlane.xlu0 %1003 }
 0xa99   :  { %2139 = vrcp.f32 %v1004_v59 }
 0xa9b   :  { %v1196_v29 = vpop.permute.xlu1 %1195 }
 0xaa0   :  { %v1191_v27 = vpop.permute.xlu0 %1190 }
 0xaa5   :  { %v2138_v60 = vpop.eup %2137 }
 0xaa6   :  { %v2140_v61 = vpop.eup %2139  ;;  %v1011_v62 = vmul.f32 %v2138_v60, %v2134_v52  ;;  %v2102_v52 = vld [vmem:[#allocation14 + $0x30] sm:$0xff]  }
 0xaa7   :  { %v1010_v63 = vmul.f32 %v2140_v61, %v2136_v53  ;;  %v2103_v53 = vld [vmem:[#allocation14 + $0x28] sm:$0xff]  }
 0xaa9   :  { %v1012_v2 = vpack.c.bf16 %v1011_v62, %v1010_v63  ;;  %v1224_v62 = vld [vmem:[%s2794_s18] sm:$0x1] }
 0xaab   :  { %1930 = vmatmul.mubr.msk.bf16.vlgmr.msra.gmra.mxu1 %vm419_vm3, %v1012_v2 }
 0xaac   :  { %1934 = vmatpush3.bf16.msra.mxu1 %v2077_v1  ;;  %1949 = vmatprep.mubr.msk.bf16.mxu1 %vm2389_vm0, %v2388_v0 }
 0xaad   :  { %1935 = vmatprep.subr.bf16.mxu1 %v2388_v0 }
 0xab0   :  { %1936 = vmatpush3.bf16.msra.mxu1 %v2078_v3 }
 0xab1   :  { %1937 = vmatprep.subr.bf16.mxu1 %v2388_v0 }
 0xab4   :  { %1938 = vmatpush3.bf16.msra.mxu1 %v2079_v4 }
 0xab5   :  { %1939 = vmatprep.subr.bf16.mxu1 %v2388_v0 }
 0xab8   :  { %1940 = vmatpush3.bf16.msra.mxu1 %v2080_v5 }
 0xab9   :  { %1941 = vmatprep.subr.bf16.mxu1 %v2388_v0 }
 0xabc   :  { %1942 = vmatpush3.bf16.msra.mxu1 %v2081_v6 }
 0xabd   :  { %1943 = vmatprep.subr.bf16.mxu1 %v2388_v0 }
 0xac0   :  { %1944 = vmatpush3.bf16.msra.mxu1 %v2083_v7  ;;  %v2107_v7 = vld [vmem:[#allocation14 + $0x8] sm:$0xff]  }
 0xac1   :  { %1945 = vmatprep.subr.bf16.mxu1 %v2388_v0 }
 0xac4   :  { %1946 = vmatpush3.bf16.msra.mxu1 %v2085_v9  ;;  %v2109_v9 = vld [vmem:[#allocation16 + $0x38] sm:$0xff]  }
 0xac5   :  { %1947 = vmatprep.subr.bf16.mxu1 %v2388_v0 }
 0xac8   :  { %1948 = vmatpush3.bf16.msra.mxu1 %v2088_v12  ;;  %v2112_v12 = vld [vmem:[#allocation16 + $0x20] sm:$0xff]  }
 0xac9   :  { %1973 = vmatprep.subr.bf16.mxu1 %v2388_v0 }
 0xb6b   :  { %v1058_v18 = vpop.f32.mrf.mxu1 }
 0xb6c   :  { %v1059_v19 = vadd.f32 %v1704_v17, %v1058_v18 }
 0xb6d   :  { %v1931_v20 = vpop.f32.mrf.mxu1 }
 0xb6e   :  { %v1067_v21 = vmul.f32 0.01, %v1059_v19  ;;  %vm1065_vm12 = vcmp.gt.f32.partialorder %v1059_v19, 0.0 }
 0xb6f   :  { %v1061_v22 = vpop.f32.mrf.mxu1 }
 0xb70   :  { %v1062_v23 = vadd.f32 %v1704_v17, %v1061_v22  ;;  %v1069_v28 = vsel %vm1065_vm12, %v1059_v19, %v1067_v21 }
 0xb71   :  { %v1932_v25 = vpop.f32.mrf.mxu1  ;;  %v1198_v32 = vmul.f32 %v1191_v27, %v1069_v28 }
 0xb72   :  { %v1068_v26 = vmul.f32 0.01, %v1062_v23  ;;  %vm1066_vm13 = vcmp.gt.f32.partialorder %v1062_v23, 0.0  ;;  %v2116_v25 = vld [vmem:[#allocation16] sm:$0xff]  }
 0xb74   :  { %v1070_v30 = vsel %vm1066_vm13, %v1062_v23, %v1068_v26  ;;  %v2115_v23 = vld [vmem:[#allocation16 + $0x8] sm:$0xff]   ;;  %v1438_v26 = vld [vmem:[%s2798_s22] sm:$0x1] }
 0xb75   :  { %v1071_v33 = vpack.c.bf16 %v1070_v30, %v1069_v28  ;;  %v1199_v34 = vmul.f32 %v1196_v29, %v1070_v30 }
 0xb77   :  { %v1200_v36 = vadd.f32 %v1199_v34, %v1198_v32  ;;  %1950 = vmatmul.mubr.bf16.vlgmr.msra.gmra.mxu1 %v1071_v33 }
 0xb78   :  { %1974 = vmatpush3.bf16.msra.mxu1 %v2093_v31  ;;  %1989 = vmatprep.mubr.msk.bf16.mxu1 %vm2389_vm0, %v2388_v0 }
 0xb79   :  { %v1201_v39 = vrot.slane %v1200_v36, 4  ;;  %1975 = vmatprep.subr.bf16.mxu1 %v2388_v0 }
 0xb7b   :  { %v1202_v40 = vadd.f32 %v1201_v39, %v1200_v36 }
 0xb7c   :  { %1976 = vmatpush3.bf16.msra.mxu1 %v2094_v37 }
 0xb7d   :  { %v1203_v41 = vrot.slane %v1202_v40, 2  ;;  %1977 = vmatprep.subr.bf16.mxu1 %v2388_v0 }
 0xb7f   :  { %v1204_v42 = vadd.f32 %v1203_v41, %v1202_v40 }
 0xb80   :  { %1978 = vmatpush3.bf16.msra.mxu1 %v2095_v46 }
 0xb81   :  { %v1205_v43 = vrot.slane %v1204_v42, 1  ;;  %1979 = vmatprep.subr.bf16.mxu1 %v2388_v0 }
 0xb83   :  { %v1206_v44 = vadd.f32 %v1205_v43, %v1204_v42 }
 0xb84   :  { %1980 = vmatpush3.bf16.msra.mxu1 %v2096_v24 }
 0xb85   :  { %v1207_v45 = vpack.c.bf16 %v1206_v44, %v1206_v44  ;;  %1981 = vmatprep.subr.bf16.mxu1 %v2388_v0 }
 0xb87   :  { %1970 = vmatmul.mubr.bf16.vlgmr.msra.gmra.mxu0 %v1207_v45 }
 0xb88   :  { %2009 = vmatprep.mubr.msk.bf16.mxu0 %vm2389_vm0, %v2388_v0  ;;  %1982 = vmatpush3.bf16.msra.mxu1 %v2097_v47 }
 0xb89   :  { %1983 = vmatprep.subr.bf16.mxu1 %v2388_v0  ;;  %1994 = vmatpush3.bf16.msra.mxu0 %v2101_v51 }
 0xb8a   :  { %1995 = vmatprep.subr.bf16.mxu0 %v2388_v0 }
 0xb8c   :  { %1984 = vmatpush3.bf16.msra.mxu1 %v2098_v48 }
 0xb8d   :  { %1985 = vmatprep.subr.bf16.mxu1 %v2388_v0  ;;  %1996 = vmatpush3.bf16.msra.mxu0 %v2102_v52 }
 0xb8e   :  { %1997 = vmatprep.subr.bf16.mxu0 %v2388_v0 }
 0xb90   :  { %1986 = vmatpush3.bf16.msra.mxu1 %v2099_v49 }
 0xb91   :  { %1987 = vmatprep.subr.bf16.mxu1 %v2388_v0  ;;  %1998 = vmatpush3.bf16.msra.mxu0 %v2103_v53 }
 0xb92   :  { %1999 = vmatprep.subr.bf16.mxu0 %v2388_v0 }
 0xb94   :  { %1988 = vmatpush3.bf16.msra.mxu1 %v2100_v50 }
 0xb95   :  { %2013 = vmatprep.subr.bf16.mxu1 %v2388_v0  ;;  %2000 = vmatpush3.bf16.msra.mxu0 %v2104_v38 }
 0xb96   :  { %2001 = vmatprep.subr.bf16.mxu0 %v2388_v0 }
 0xb99   :  { %2002 = vmatpush3.bf16.msra.mxu0 %v2105_v35 }
 0xb9a   :  { %2003 = vmatprep.subr.bf16.mxu0 %v2388_v0 }
 0xb9d   :  { %2004 = vmatpush3.bf16.msra.mxu0 %v2106_v54 }
 0xb9e   :  { %2005 = vmatprep.subr.bf16.mxu0 %v2388_v0 }
 0xba1   :  { %2006 = vmatpush3.bf16.msra.mxu0 %v2107_v7 }
 0xba2   :  { %2007 = vmatprep.subr.bf16.mxu0 %v2388_v0 }
 0xba5   :  { %2008 = vmatpush3.bf16.msra.mxu0 %v2108_v8 }
 0xc37   :  { %v1177_v56 = vpop.f32.mrf.mxu1 }
 0xc38   :  { %v1178_v57 = vadd.f32 %v1706_v55, %v1177_v56 }
 0xc39   :  { %v1951_v58 = vpop.f32.mrf.mxu1 }
 0xc3a   :  { %1184 = vst [vmem:[#allocation17] sm:$0xff] %v1178_v57 }
 0xc3b   :  { %v1180_v59 = vpop.f32.mrf.mxu1 }
 0xc3c   :  { %v1181_v60 = vadd.f32 %v1706_v55, %v1180_v59 }
 0xc3d   :  { %v1952_v61 = vpop.f32.mrf.mxu1 }
 0xc3e   :  { %1185 = vst [vmem:[#allocation17 + $0x8] sm:$0xff] %v1181_v60 }
 0xc47   :  { %v1307_v63 = vpop.f32.mrf.mxu0 }
 0xc48   :  { %v1308_v1 = vadd.f32 %v1307_v63, %v1224_v62 }
 0xc49   :  { %v1971_v2 = vpop.f32.mrf.mxu0 }
 0xc4a   :  { %v1313_v3 = vmax.f32 %v1308_v1, 0.0 }
 0xc4b   :  { %v1310_v4 = vpop.f32.mrf.mxu0 }
 0xc4c   :  { %v1314_v5 = vpack.c.bf16 %v1313_v3, %v1313_v3 }
 0xc4d   :  { %v1972_v6 = vpop.f32.mrf.mxu0 }
 0xc4e   :  { %1990 = vmatmul.mubr.bf16.vlgmr.msra.gmra.mxu1 %v1314_v5 }
 0xc4f   :  { %2029 = vmatprep.mubr.msk.bf16.mxu1 %vm2389_vm0, %v2388_v0  ;;  %2014 = vmatpush3.bf16.msra.mxu1 %v2109_v9 }
 0xc50   :  { %2015 = vmatprep.subr.bf16.mxu1 %v2388_v0 }
 0xc53   :  { %2016 = vmatpush3.bf16.msra.mxu1 %v2110_v10 }
 0xc54   :  { %2017 = vmatprep.subr.bf16.mxu1 %v2388_v0 }
 0xc57   :  { %2018 = vmatpush3.bf16.msra.mxu1 %v2111_v11 }
 0xc58   :  { %2019 = vmatprep.subr.bf16.mxu1 %v2388_v0 }
 0xc5b   :  { %2020 = vmatpush3.bf16.msra.mxu1 %v2112_v12 }
 0xc5c   :  { %2021 = vmatprep.subr.bf16.mxu1 %v2388_v0 }
 0xc5f   :  { %2022 = vmatpush3.bf16.msra.mxu1 %v2113_v13 }
 0xc60   :  { %2023 = vmatprep.subr.bf16.mxu1 %v2388_v0 }
 0xc63   :  { %2024 = vmatpush3.bf16.msra.mxu1 %v2114_v14 }
 0xc64   :  { %2025 = vmatprep.subr.bf16.mxu1 %v2388_v0 }
 0xc67   :  { %2026 = vmatpush3.bf16.msra.mxu1 %v2115_v23 }
 0xc68   :  { %2027 = vmatprep.subr.bf16.mxu1 %v2388_v0 }
 0xc6b   :  { %2028 = vmatpush3.bf16.msra.mxu1 %v2116_v25 }
 0xd0e   :  { %v1414_v16 = vpop.f32.mrf.mxu1 }
 0xd0f   :  { %v1415_v17 = vadd.f32 %v1414_v16, %v1331_v15 }
 0xd10   :  { %v1991_v18 = vpop.f32.mrf.mxu1 }
 0xd11   :  { %v1420_v19 = vmax.f32 %v1415_v17, 0.0 }
 0xd12   :  { %v1417_v20 = vpop.f32.mrf.mxu1 }
 0xd13   :  { %v1421_v21 = vpack.c.bf16 %v1420_v19, %v1420_v19 }
 0xd14   :  { %v1992_v22 = vpop.f32.mrf.mxu1 }
 0xd15   :  { %2010 = vmatmul.mubr.bf16.vlgmr.msra.gmra.mxu0 %v1421_v21 }
 0xdd5   :  { %v1521_v27 = vpop.f32.mrf.mxu0 }
 0xdd6   :  { %v1522_v28 = vadd.f32 %v1521_v27, %v1438_v26 }
 0xdd7   :  { %v2011_v29 = vpop.f32.mrf.mxu0 }
 0xdd8   :  { %v1527_v30 = vmax.f32 %v1522_v28, 0.0 }
 0xdd9   :  { %v1524_v31 = vpop.f32.mrf.mxu0 }
 0xdda   :  { %v1528_v32 = vpack.c.bf16 %v1527_v30, %v1527_v30 }
 0xddb   :  { %v2012_v33 = vpop.f32.mrf.mxu0 }
 0xddc   :  { %2030 = vmatmul.mubr.bf16.vlgmr.msra.gmra.mxu1 %v1528_v32 }
 0xddd   :  { %2332 = shalt.err (!%p2329_p7)
}
 0xdde   :  { %1647 = dma.vmem_to_hbm [thread:$0]  %s1642_s0, 256, %s2801_s25, [#allocation4], %s2382_s5, %s2382_s5, %s2383_s10  }
 0xddf   :  { %v1545_v0 = vld [vmem:[%s2800_s24] sm:$0x1]  ;;  %s2392_s9 = smov [#allocation18]  }
 0xde0   :  { %s1654_s30 = sshll.u32 %s2392_s9, 4  ;;  %s1655_s30 = int_to_ptr.vmem [resolvable:$true] %s1654_s30 }
 0xde1   :  { %s2341_s11 = scalar_lea.vmem %s1655_s30, 16  ;;  %s2345_s2 = scalar_lea.vmem %s1655_s30, 32 }
 0xde2   :  { %p2342_p8 = scmp.ne.s32.totalorder %s1655_s30, %s2341_s11  ;;  %p2346_p9 = scmp.lt.s32.totalorder %s1655_s30, %s1655_s30 }
 0xde3   :  { %p2347_p10 = scmp.lt.s32.totalorder %s2345_s2, %s2341_s11 }
 0xde5   :  { %p2348_p11 = por %p2347_p10, %p2346_p9 }
 0xde7   :  { %p2349_p12 = pnand %p2348_p11, %p2342_p8 }
 0xe9c   :  { %v1628_v34 = vpop.f32.mrf.mxu1 }
 0xe9d   :  { %v1629_v36 = vadd.f32 %v1628_v34, %v1545_v0 }
 0xe9e   :  { %v2031_v37 = vpop.f32.mrf.mxu1 }
 0xe9f   :  { %v1634_v39 = vmax.f32 %v1629_v36, 0.0 }
 0xea0   :  { %v1631_v40 = vpop.f32.mrf.mxu1 }
 0xea1   :  { %1635 = vst [vmem:[#allocation18] sm:$0x1] %v1634_v39 }
 0xea2   :  { %v2032_v41 = vpop.f32.mrf.mxu1 }
 0xea3   :  { %2352 = shalt.err (!%p2349_p12)
}
 0xea4   :  { %1657 = dma.vmem_to_hbm [thread:$0]  %s1655_s30, 16, %s2802_s26, [#allocation19]  }
 0xea5   :  { %2371 = dma.done.wait [#allocation4], 256  }
 0xea6   :  { %2372 = vsyncadd [#allocation4], 4294967040 }
 0xea7   :  { %2373 = dma.done.wait [#allocation19], 16  }
 0xea8   :  { %2374 = vsyncadd [#allocation19], 4294967280 }
 0xea9   :  { %1664 = vsyncpa [#allocation3], 1 }
 0xeaa   :  { %1665 = vsyncpa [#allocation6], 1 }
 0xeab   :  { %1666 = vsyncpa [#allocation9], 1 }
 0xeac   :  { %1667 = vsyncpa [#allocation12], 1 }
 0xead   :  { %1668 = vsyncpa [#allocation15], 1 }
 0xeae   :  { %1669 = vsyncpa [#allocation4], 1 }
 0xeaf   :  { %1670 = vsyncpa [#allocation19], 1 }

</bundles_post_ra>
